<compile_context>
chip_gen: v5e
topology: v5e:2x2
jax: 0.10.0
libtpu: 0.0.40
codegen_flags: <defaults>
</compile_context>

<pallas_src>
import jax
import jax.numpy as jnp
from jax import lax
from jax.experimental import pallas as pl
from jax.experimental.pallas import tpu as pltpu

ACT = 27                 # conv output spatial size
KSZ = 6                  # kernel size
NKER = 16                # n_kernels
LIN = 16                 # lin_units
CIN = 2                  # input channels
NOUT = 2                 # final output width
HW_IN = ACT + KSZ - 1    # 32 input spatial size implied by act_size
NPATCH = ACT * ACT       # 729
PDIM = CIN * KSZ * KSZ   # 72
FLAT = NKER * NPATCH     # 11664


# ---------------------------------------------------------------------------
# Fused Pallas kernel: conv -> (flatten+ReLU) -> fc1+ReLU -> fc2
# ---------------------------------------------------------------------------
def _mnet_kernel(p_ref, cw_ref, cb_ref, w1_ref, b1_ref, w2_ref, b2_ref,
                 conv_ref, flat_ref, fc1_ref, fc2_ref, r_ref):
    # p_ref   : (Ft, 72, 729) bf16  im2col patches, rows ordered (cin, kh, kw)
    # cw_ref  : (16, 72)      bf16  conv weight (cout, cin*kh*kw)
    # cb_ref  : (16, 1)       f32   conv bias
    # w1_ref  : (16, 16, 729) f32   fc1 weight as (conv_ch, lin_unit, patch)
    # b1_ref  : (1, 16), w2_ref: (2, 16), b2_ref: (1, 2)   f32
    # conv_ref, flat_ref : (Ft, 16, 729) bf16
    # fc1_ref : (Ft, 16) f32 ; fc2_ref : (Ft, 2) f32
    # r_ref   : (Ft, 16, 729) f32 VMEM scratch (post-ReLU activations)
    ft = p_ref.shape[0]
    cdims = (((1,), (1,)), ((), ()))                 # contract last dims of both

    cw = cw_ref[...]                                 # (16, 72)
    cb = jnp.broadcast_to(cb_ref[...], (NKER, NPATCH))   # hoisted lane-broadcast

    # ---- conv + flatten/ReLU, one frame at a time.  Real loop (not unrolled)
    # keeps vreg live ranges bounded; per-iteration work is an MXU matmul so
    # loop overhead is negligible. ----
    @pl.loop(0, ft)
    def _(f):
        # Conv as W(16,72) @ P(72,729): output tile is (C=16, HW=729), i.e.
        # already CHW-flatten order; stores are lane-dense.
        conv_f = jnp.dot(cw, p_ref[f],
                         preferred_element_type=jnp.float32) + cb     # (16, 729)
        r = jnp.maximum(conv_f, 0.0)                                   # Flatten+ReLU
        conv_ref[f] = conv_f.astype(conv_ref.dtype)   # bf16 store (halves HBM writes)
        flat_ref[f] = r.astype(flat_ref.dtype)
        r_ref[f] = r                                  # f32 copy stays in VMEM for fc1

    # ---- fc1: frame-batched, per conv-channel so the 729 axis stays on lanes
    # for both activation and weight (no 6 MiB padded weight, M=Ft not M=1). ----
    acc = jnp.zeros((ft, LIN), jnp.float32)
    for c in range(NKER):                             # small loop, kept unrolled
        acc = acc + lax.dot_general(
            r_ref[:, c, :], w1_ref[c], dimension_numbers=cdims,
            preferred_element_type=jnp.float32)       # (Ft, 729)@(729,16) -> (Ft,16)
    h = jnp.maximum(acc + b1_ref[...], 0.0)           # (Ft, 16)
    fc1_ref[...] = h                                  # one consolidated store

    # ---- fc2 ----
    fc2_ref[...] = lax.dot_general(h, w2_ref[...], dimension_numbers=cdims,
                                   preferred_element_type=jnp.float32) + b2_ref[...]


# ---------------------------------------------------------------------------
# Wrapper (layout glue only)
# ---------------------------------------------------------------------------
def _im2col_t(x):
    # x: (N, 2, 32, 32) f32 -> (N, 72, 729) bf16; row axis ordered (cin, kh, kw),
    # column axis (h, w) row-major.  bf16 halves the dominant HBM round trip.
    n = x.shape[0]
    xb = x.astype(jnp.bfloat16)
    rows = []
    for c in range(CIN):
        for kh in range(KSZ):
            for kw in range(KSZ):
                rows.append(xb[:, c, kh:kh + ACT, kw:kw + ACT].reshape(n, NPATCH))
    return jnp.stack(rows, axis=1)


def _pick_ft(num_frames, max_ft=16):
    # Largest divisor of F giving >= ~4 frame-blocks (pipelining + megacore),
    # capped so the per-step working set stays a few MiB (v5e/v7x VMEM safe).
    target = max(1, min(max_ft, num_frames // 4 if num_frames >= 4 else num_frames))
    for d in range(target, 0, -1):
        if num_frames % d == 0:
            return d
    return 1


def mnet_forward(x, params):
    # x: (B, F, 2, 32, 32) -> (out_fc2, out_conv, out_flat, out_fc1)
    B, F, C, H, W = x.shape
    assert C == CIN and H == HW_IN and W == HW_IN
    ft = _pick_ft(F)
    nfb = F // ft
    assert nfb * ft == F

    patches = _im2col_t(x.reshape(B * F, C, H, W)).reshape(B, F, PDIM, NPATCH)

    cw = params["conv_w"].reshape(NKER, PDIM).astype(jnp.bfloat16)   # (16, 72)
    cb = params["conv_b"].reshape(NKER, 1)                           # (16, 1)
    # fc1 weight with the 729 axis on lanes: (conv_ch, lin_unit, patch)
    w1 = params["fc1_w"].reshape(LIN, NKER, NPATCH).transpose(1, 0, 2)
    b1 = params["fc1_b"].reshape(1, LIN)
    w2 = params["fc2_w"]                                             # (2, 16)
    b2 = params["fc2_b"].reshape(1, NOUT)

    conv, flat, fc1, fc2 = pl.pallas_call(
        _mnet_kernel,
        out_shape=(
            jax.ShapeDtypeStruct((B, F, NKER, NPATCH), jnp.bfloat16),   # conv (CHW)
            jax.ShapeDtypeStruct((B, F, NKER, NPATCH), jnp.bfloat16),   # flat (ReLU)
            jax.ShapeDtypeStruct((B, nfb, ft, LIN), jnp.float32),
            jax.ShapeDtypeStruct((B, nfb, ft, NOUT), jnp.float32),
        ),
        grid=(B, nfb),
        in_specs=[
            pl.BlockSpec((None, ft, PDIM, NPATCH), lambda b, f: (b, f, 0, 0)),
            pl.BlockSpec((NKER, PDIM), lambda b, f: (0, 0)),
            pl.BlockSpec((NKER, 1), lambda b, f: (0, 0)),
            pl.BlockSpec((NKER, LIN, NPATCH), lambda b, f: (0, 0, 0)),
            pl.BlockSpec((1, LIN), lambda b, f: (0, 0)),
            pl.BlockSpec((NOUT, LIN), lambda b, f: (0, 0)),
            pl.BlockSpec((1, NOUT), lambda b, f: (0, 0)),
        ],
        out_specs=(
            pl.BlockSpec((None, ft, NKER, NPATCH), lambda b, f: (b, f, 0, 0)),
            pl.BlockSpec((None, ft, NKER, NPATCH), lambda b, f: (b, f, 0, 0)),
            pl.BlockSpec((None, None, ft, LIN), lambda b, f: (b, f, 0, 0)),
            pl.BlockSpec((None, None, ft, NOUT), lambda b, f: (b, f, 0, 0)),
        ),
        scratch_shapes=[pltpu.VMEM((ft, NKER, NPATCH), jnp.float32)],
        compiler_params=pltpu.CompilerParams(
            dimension_semantics=("parallel", "parallel")),   # batch & frame blocks
    )(patches, cw, cb, w1, b1, w2, b2)

    # Free reshapes (no transposes).  out_conv / out_flat are bf16 (perf: halves
    # the dominant HBM write traffic; fc2/fc1 remain f32).
    out_conv = conv.reshape(B, F, NKER, ACT, ACT)
    out_flat = flat.reshape(B, F, FLAT)
    out_fc1 = fc1.reshape(B, F, LIN)
    out_fc2 = fc2.reshape(B, F, NOUT)
    return out_fc2, out_conv, out_flat, out_fc1


# ---------------------------------------------------------------------------
# Plain-JAX reference (independent of the kernel's im2col path)
# ---------------------------------------------------------------------------
def _mnet_ref(x, params):
    B, F, C, H, W = x.shape
    hp = lax.Precision.HIGHEST
    xs = x.reshape(B * F, C, H, W)
    conv = lax.conv_general_dilated(
        xs, params["conv_w"], (1, 1), "VALID",
        dimension_numbers=("NCHW", "OIHW", "NCHW"), precision=hp)
    conv = conv + params["conv_b"].reshape(1, NKER, 1, 1)
    flat = jnp.maximum(conv.reshape(B * F, FLAT), 0.0)
    h = jnp.maximum(jnp.matmul(flat, params["fc1_w"].T, precision=hp)
                    + params["fc1_b"], 0.0)
    o = jnp.matmul(h, params["fc2_w"].T, precision=hp) + params["fc2_b"]
    return (o.reshape(B, F, NOUT),
            conv.reshape(B, F, NKER, ACT, ACT),
            flat.reshape(B, F, FLAT),
            h.reshape(B, F, LIN))


def init_params(key):
    # Matches the PyTorch init: normal(0, 0.01) weights, bias filled with 0.01.
    k1, k2, k3 = jax.random.split(key, 3)
    return dict(
        conv_w=0.01 * jax.random.normal(k1, (NKER, CIN, KSZ, KSZ), jnp.float32),
        conv_b=jnp.full((NKER,), 0.01, jnp.float32),
        fc1_w=0.01 * jax.random.normal(k2, (LIN, FLAT), jnp.float32),
        fc1_b=jnp.full((LIN,), 0.01, jnp.float32),
        fc2_w=0.01 * jax.random.normal(k3, (NOUT, LIN), jnp.float32),
        fc2_b=jnp.full((NOUT,), 0.01, jnp.float32),
    )


if __name__ == "__main__":
    key = jax.random.PRNGKey(0)
    kx, kp = jax.random.split(key)
    B, F = 2, 8  # small batch / num_frames; spatial 32 is fixed by act_size=27
    x = jax.random.normal(kx, (B, F, CIN, HW_IN, HW_IN), jnp.float32)
    params = init_params(kp)

    outs = jax.block_until_ready(jax.jit(mnet_forward)(x, params))
    out_fc2, out_conv, out_flat, out_fc1 = outs

    assert out_fc2.shape == (B, F, NOUT)
    assert out_conv.shape == (B, F, NKER, ACT, ACT)
    assert out_flat.shape == (B, F, FLAT)
    assert out_fc1.shape == (B, F, LIN)

    refs = _mnet_ref(x, params)
    for got, ref in zip(outs, refs):
        assert jnp.allclose(got.astype(jnp.float32), ref,
                            rtol=2e-2, atol=3e-3), "mismatch vs reference"

    print("KERNEL_OK")
</pallas_src>

<mosaic_0001>
module attributes {stable_mosaic.version = 11 : i64} {
  func.func @_mnet_kernel(%arg0: i32, %arg1: i32, %arg2: memref<1x2x72x729xbf16, #tpu.memory_space<vmem>>, %arg3: memref<16x72xbf16, #tpu.memory_space<vmem>>, %arg4: memref<16x1xf32, #tpu.memory_space<vmem>>, %arg5: memref<16x16x729xf32, #tpu.memory_space<vmem>>, %arg6: memref<1x16xf32, #tpu.memory_space<vmem>>, %arg7: memref<2x16xf32, #tpu.memory_space<vmem>>, %arg8: memref<1x2xf32, #tpu.memory_space<vmem>>, %arg9: memref<1x2x16x729xbf16, #tpu.memory_space<vmem>>, %arg10: memref<1x2x16x729xbf16, #tpu.memory_space<vmem>>, %arg11: memref<1x1x2x16xf32, #tpu.memory_space<vmem>>, %arg12: memref<1x1x2x2xf32, #tpu.memory_space<vmem>>, %arg13: memref<2x16x729xf32, #tpu.memory_space<vmem>>) attributes {dimension_semantics = [#tpu.dimension_semantics<parallel>, #tpu.dimension_semantics<parallel>], iteration_bounds = array<i64: 2, 4>, scalar_prefetch = 0 : i64, scratch_operands = 1 : i64, tpu.core_type = #tpu.core_type<tc>, window_params = [{transform_indices = @transform_0, window_bounds = array<i64: 1, 2, 72, 729>}, {pipeline_mode = #tpu.pipeline_mode<synchronous>, transform_indices = @transform_1, window_bounds = array<i64: 16, 72>}, {pipeline_mode = #tpu.pipeline_mode<synchronous>, transform_indices = @transform_2, window_bounds = array<i64: 16, 1>}, {pipeline_mode = #tpu.pipeline_mode<synchronous>, transform_indices = @transform_3, window_bounds = array<i64: 16, 16, 729>}, {pipeline_mode = #tpu.pipeline_mode<synchronous>, transform_indices = @transform_4, window_bounds = array<i64: 1, 16>}, {pipeline_mode = #tpu.pipeline_mode<synchronous>, transform_indices = @transform_5, window_bounds = array<i64: 2, 16>}, {pipeline_mode = #tpu.pipeline_mode<synchronous>, transform_indices = @transform_6, window_bounds = array<i64: 1, 2>}, {transform_indices = @transform_7, window_bounds = array<i64: 1, 2, 16, 729>}, {transform_indices = @transform_8, window_bounds = array<i64: 1, 2, 16, 729>}, {transform_indices = @transform_9, window_bounds = array<i64: 1, 1, 2, 16>}, {transform_indices = @transform_10, window_bounds = array<i64: 1, 1, 2, 2>}]} {
    %c0 = arith.constant 0 : index
    %c0_0 = arith.constant 0 : index
    %0 = vector.load %arg3[%c0, %c0_0] : memref<16x72xbf16, #tpu.memory_space<vmem>>, vector<16x72xbf16>
    %c0_1 = arith.constant 0 : index
    %c0_2 = arith.constant 0 : index
    %1 = vector.load %arg4[%c0_1, %c0_2] : memref<16x1xf32, #tpu.memory_space<vmem>>, vector<16x1xf32>
    %2 = vector.shape_cast %1 : vector<16x1xf32> to vector<16x1xf32>
    %3 = vector.broadcast %2 : vector<16x1xf32> to vector<16x729xf32>
    %c0_i32 = arith.constant 0 : i32
    %c2_i32 = arith.constant 2 : i32
    %4 = arith.addi %c0_i32, %c2_i32 : i32
    %c1_i32 = arith.constant 1 : i32
    scf.for %arg14 = %c0_i32 to %4 step %c1_i32  : i32 {
      %c1_i32_117 = arith.constant 1 : i32
      %118 = arith.muli %arg14, %c1_i32_117 : i32
      %c0_i32_118 = arith.constant 0 : i32
      %119 = arith.addi %c0_i32_118, %118 : i32
      %c0_119 = arith.constant 0 : index
      %120 = arith.index_cast %119 : i32 to index
      %c0_120 = arith.constant 0 : index
      %c0_121 = arith.constant 0 : index
      %121 = vector.load %arg2[%c0_119, %120, %c0_120, %c0_121] : memref<1x2x72x729xbf16, #tpu.memory_space<vmem>>, vector<1x1x72x729xbf16>
      %122 = vector.shape_cast %121 : vector<1x1x72x729xbf16> to vector<72x729xbf16>
      %cst_122 = arith.constant dense<0.000000e+00> : vector<16x729xf32>
      %123 = tpu.matmul %0, %122, %cst_122 {dimension_numbers = #tpu.dot_dimension_numbers<[1], [0], [0], [1], [0, 0, 1, 1], [], []>} : vector<16x72xbf16>, vector<72x729xbf16>, vector<16x729xf32> -> vector<16x729xf32>
      %124 = arith.addf %123, %3 : vector<16x729xf32>
      %cst_123 = arith.constant 0.000000e+00 : f32
      %125 = vector.broadcast %cst_123 : f32 to vector<16x729xf32>
      %126 = arith.maximumf %124, %125 : vector<16x729xf32>
      %127 = arith.truncf %124 : vector<16x729xf32> to vector<16x729xbf16>
      %c0_124 = arith.constant 0 : index
      %128 = arith.index_cast %119 : i32 to index
      %c0_125 = arith.constant 0 : index
      %c0_126 = arith.constant 0 : index
      %129 = vector.load %arg9[%c0_124, %128, %c0_125, %c0_126] : memref<1x2x16x729xbf16, #tpu.memory_space<vmem>>, vector<1x1x16x729xbf16>
      %130 = vector.shape_cast %129 : vector<1x1x16x729xbf16> to vector<16x729xbf16>
      %131 = vector.shape_cast %127 : vector<16x729xbf16> to vector<1x1x16x729xbf16>
      tpu.vector_store %arg9[%c0_124, %128, %c0_125, %c0_126], %131 {strides = array<i32>} : memref<1x2x16x729xbf16, #tpu.memory_space<vmem>>, vector<1x1x16x729xbf16>,
      %132 = arith.truncf %126 : vector<16x729xf32> to vector<16x729xbf16>
      %c0_127 = arith.constant 0 : index
      %133 = arith.index_cast %119 : i32 to index
      %c0_128 = arith.constant 0 : index
      %c0_129 = arith.constant 0 : index
      %134 = vector.load %arg10[%c0_127, %133, %c0_128, %c0_129] : memref<1x2x16x729xbf16, #tpu.memory_space<vmem>>, vector<1x1x16x729xbf16>
      %135 = vector.shape_cast %134 : vector<1x1x16x729xbf16> to vector<16x729xbf16>
      %136 = vector.shape_cast %132 : vector<16x729xbf16> to vector<1x1x16x729xbf16>
      tpu.vector_store %arg10[%c0_127, %133, %c0_128, %c0_129], %136 {strides = array<i32>} : memref<1x2x16x729xbf16, #tpu.memory_space<vmem>>, vector<1x1x16x729xbf16>,
      %137 = arith.index_cast %119 : i32 to index
      %c0_130 = arith.constant 0 : index
      %c0_131 = arith.constant 0 : index
      %138 = vector.load %arg13[%137, %c0_130, %c0_131] : memref<2x16x729xf32, #tpu.memory_space<vmem>>, vector<1x16x729xf32>
      %139 = vector.shape_cast %138 : vector<1x16x729xf32> to vector<16x729xf32>
      %140 = vector.shape_cast %126 : vector<16x729xf32> to vector<1x16x729xf32>
      tpu.vector_store %arg13[%137, %c0_130, %c0_131], %140 {strides = array<i32>} : memref<2x16x729xf32, #tpu.memory_space<vmem>>, vector<1x16x729xf32>,
    }
    %c2_i32_3 = arith.constant 2 : i32
    %cst = arith.constant 0.000000e+00 : f32
    %5 = vector.broadcast %cst : f32 to vector<2x16xf32>
    %c0_4 = arith.constant 0 : index
    %c0_5 = arith.constant 0 : index
    %c0_6 = arith.constant 0 : index
    %6 = vector.load %arg13[%c0_4, %c0_5, %c0_6] : memref<2x16x729xf32, #tpu.memory_space<vmem>>, vector<2x1x729xf32>
    %7 = vector.shape_cast %6 : vector<2x1x729xf32> to vector<2x729xf32>
    %c0_7 = arith.constant 0 : index
    %c0_8 = arith.constant 0 : index
    %c0_9 = arith.constant 0 : index
    %8 = vector.load %arg5[%c0_7, %c0_8, %c0_9] : memref<16x16x729xf32, #tpu.memory_space<vmem>>, vector<1x16x729xf32>
    %9 = vector.shape_cast %8 : vector<1x16x729xf32> to vector<16x729xf32>
    %cst_10 = arith.constant dense<0.000000e+00> : vector<2x16xf32>
    %10 = tpu.matmul %7, %9, %cst_10 {dimension_numbers = #tpu.dot_dimension_numbers<[1], [1], [0], [0], [0, 0, 1, 0], [], []>} : vector<2x729xf32>, vector<16x729xf32>, vector<2x16xf32> -> vector<2x16xf32>
    %11 = arith.addf %5, %10 : vector<2x16xf32>
    %c0_11 = arith.constant 0 : index
    %c1 = arith.constant 1 : index
    %c0_12 = arith.constant 0 : index
    %12 = vector.load %arg13[%c0_11, %c1, %c0_12] : memref<2x16x729xf32, #tpu.memory_space<vmem>>, vector<2x1x729xf32>
    %13 = vector.shape_cast %12 : vector<2x1x729xf32> to vector<2x729xf32>
    %c1_13 = arith.constant 1 : index
    %c0_14 = arith.constant 0 : index
    %c0_15 = arith.constant 0 : index
    %14 = vector.load %arg5[%c1_13, %c0_14, %c0_15] : memref<16x16x729xf32, #tpu.memory_space<vmem>>, vector<1x16x729xf32>
    %15 = vector.shape_cast %14 : vector<1x16x729xf32> to vector<16x729xf32>
    %cst_16 = arith.constant dense<0.000000e+00> : vector<2x16xf32>
    %16 = tpu.matmul %13, %15, %cst_16 {dimension_numbers = #tpu.dot_dimension_numbers<[1], [1], [0], [0], [0, 0, 1, 0], [], []>} : vector<2x729xf32>, vector<16x729xf32>, vector<2x16xf32> -> vector<2x16xf32>
    %17 = arith.addf %11, %16 : vector<2x16xf32>
    %c0_17 = arith.constant 0 : index
    %c2 = arith.constant 2 : index
    %c0_18 = arith.constant 0 : index
    %18 = vector.load %arg13[%c0_17, %c2, %c0_18] : memref<2x16x729xf32, #tpu.memory_space<vmem>>, vector<2x1x729xf32>
    %19 = vector.shape_cast %18 : vector<2x1x729xf32> to vector<2x729xf32>
    %c2_19 = arith.constant 2 : index
    %c0_20 = arith.constant 0 : index
    %c0_21 = arith.constant 0 : index
    %20 = vector.load %arg5[%c2_19, %c0_20, %c0_21] : memref<16x16x729xf32, #tpu.memory_space<vmem>>, vector<1x16x729xf32>
    %21 = vector.shape_cast %20 : vector<1x16x729xf32> to vector<16x729xf32>
    %cst_22 = arith.constant dense<0.000000e+00> : vector<2x16xf32>
    %22 = tpu.matmul %19, %21, %cst_22 {dimension_numbers = #tpu.dot_dimension_numbers<[1], [1], [0], [0], [0, 0, 1, 0], [], []>} : vector<2x729xf32>, vector<16x729xf32>, vector<2x16xf32> -> vector<2x16xf32>
    %23 = arith.addf %17, %22 : vector<2x16xf32>
    %c0_23 = arith.constant 0 : index
    %c3 = arith.constant 3 : index
    %c0_24 = arith.constant 0 : index
    %24 = vector.load %arg13[%c0_23, %c3, %c0_24] : memref<2x16x729xf32, #tpu.memory_space<vmem>>, vector<2x1x729xf32>
    %25 = vector.shape_cast %24 : vector<2x1x729xf32> to vector<2x729xf32>
    %c3_25 = arith.constant 3 : index
    %c0_26 = arith.constant 0 : index
    %c0_27 = arith.constant 0 : index
    %26 = vector.load %arg5[%c3_25, %c0_26, %c0_27] : memref<16x16x729xf32, #tpu.memory_space<vmem>>, vector<1x16x729xf32>
    %27 = vector.shape_cast %26 : vector<1x16x729xf32> to vector<16x729xf32>
    %cst_28 = arith.constant dense<0.000000e+00> : vector<2x16xf32>
    %28 = tpu.matmul %25, %27, %cst_28 {dimension_numbers = #tpu.dot_dimension_numbers<[1], [1], [0], [0], [0, 0, 1, 0], [], []>} : vector<2x729xf32>, vector<16x729xf32>, vector<2x16xf32> -> vector<2x16xf32>
    %29 = arith.addf %23, %28 : vector<2x16xf32>
    %c0_29 = arith.constant 0 : index
    %c4 = arith.constant 4 : index
    %c0_30 = arith.constant 0 : index
    %30 = vector.load %arg13[%c0_29, %c4, %c0_30] : memref<2x16x729xf32, #tpu.memory_space<vmem>>, vector<2x1x729xf32>
    %31 = vector.shape_cast %30 : vector<2x1x729xf32> to vector<2x729xf32>
    %c4_31 = arith.constant 4 : index
    %c0_32 = arith.constant 0 : index
    %c0_33 = arith.constant 0 : index
    %32 = vector.load %arg5[%c4_31, %c0_32, %c0_33] : memref<16x16x729xf32, #tpu.memory_space<vmem>>, vector<1x16x729xf32>
    %33 = vector.shape_cast %32 : vector<1x16x729xf32> to vector<16x729xf32>
    %cst_34 = arith.constant dense<0.000000e+00> : vector<2x16xf32>
    %34 = tpu.matmul %31, %33, %cst_34 {dimension_numbers = #tpu.dot_dimension_numbers<[1], [1], [0], [0], [0, 0, 1, 0], [], []>} : vector<2x729xf32>, vector<16x729xf32>, vector<2x16xf32> -> vector<2x16xf32>
    %35 = arith.addf %29, %34 : vector<2x16xf32>
    %c0_35 = arith.constant 0 : index
    %c5 = arith.constant 5 : index
    %c0_36 = arith.constant 0 : index
    %36 = vector.load %arg13[%c0_35, %c5, %c0_36] : memref<2x16x729xf32, #tpu.memory_space<vmem>>, vector<2x1x729xf32>
    %37 = vector.shape_cast %36 : vector<2x1x729xf32> to vector<2x729xf32>
    %c5_37 = arith.constant 5 : index
    %c0_38 = arith.constant 0 : index
    %c0_39 = arith.constant 0 : index
    %38 = vector.load %arg5[%c5_37, %c0_38, %c0_39] : memref<16x16x729xf32, #tpu.memory_space<vmem>>, vector<1x16x729xf32>
    %39 = vector.shape_cast %38 : vector<1x16x729xf32> to vector<16x729xf32>
    %cst_40 = arith.constant dense<0.000000e+00> : vector<2x16xf32>
    %40 = tpu.matmul %37, %39, %cst_40 {dimension_numbers = #tpu.dot_dimension_numbers<[1], [1], [0], [0], [0, 0, 1, 0], [], []>} : vector<2x729xf32>, vector<16x729xf32>, vector<2x16xf32> -> vector<2x16xf32>
    %41 = arith.addf %35, %40 : vector<2x16xf32>
    %c0_41 = arith.constant 0 : index
    %c6 = arith.constant 6 : index
    %c0_42 = arith.constant 0 : index
    %42 = vector.load %arg13[%c0_41, %c6, %c0_42] : memref<2x16x729xf32, #tpu.memory_space<vmem>>, vector<2x1x729xf32>
    %43 = vector.shape_cast %42 : vector<2x1x729xf32> to vector<2x729xf32>
    %c6_43 = arith.constant 6 : index
    %c0_44 = arith.constant 0 : index
    %c0_45 = arith.constant 0 : index
    %44 = vector.load %arg5[%c6_43, %c0_44, %c0_45] : memref<16x16x729xf32, #tpu.memory_space<vmem>>, vector<1x16x729xf32>
    %45 = vector.shape_cast %44 : vector<1x16x729xf32> to vector<16x729xf32>
    %cst_46 = arith.constant dense<0.000000e+00> : vector<2x16xf32>
    %46 = tpu.matmul %43, %45, %cst_46 {dimension_numbers = #tpu.dot_dimension_numbers<[1], [1], [0], [0], [0, 0, 1, 0], [], []>} : vector<2x729xf32>, vector<16x729xf32>, vector<2x16xf32> -> vector<2x16xf32>
    %47 = arith.addf %41, %46 : vector<2x16xf32>
    %c0_47 = arith.constant 0 : index
    %c7 = arith.constant 7 : index
    %c0_48 = arith.constant 0 : index
    %48 = vector.load %arg13[%c0_47, %c7, %c0_48] : memref<2x16x729xf32, #tpu.memory_space<vmem>>, vector<2x1x729xf32>
    %49 = vector.shape_cast %48 : vector<2x1x729xf32> to vector<2x729xf32>
    %c7_49 = arith.constant 7 : index
    %c0_50 = arith.constant 0 : index
    %c0_51 = arith.constant 0 : index
    %50 = vector.load %arg5[%c7_49, %c0_50, %c0_51] : memref<16x16x729xf32, #tpu.memory_space<vmem>>, vector<1x16x729xf32>
    %51 = vector.shape_cast %50 : vector<1x16x729xf32> to vector<16x729xf32>
    %cst_52 = arith.constant dense<0.000000e+00> : vector<2x16xf32>
    %52 = tpu.matmul %49, %51, %cst_52 {dimension_numbers = #tpu.dot_dimension_numbers<[1], [1], [0], [0], [0, 0, 1, 0], [], []>} : vector<2x729xf32>, vector<16x729xf32>, vector<2x16xf32> -> vector<2x16xf32>
    %53 = arith.addf %47, %52 : vector<2x16xf32>
    %c0_53 = arith.constant 0 : index
    %c8 = arith.constant 8 : index
    %c0_54 = arith.constant 0 : index
    %54 = vector.load %arg13[%c0_53, %c8, %c0_54] : memref<2x16x729xf32, #tpu.memory_space<vmem>>, vector<2x1x729xf32>
    %55 = vector.shape_cast %54 : vector<2x1x729xf32> to vector<2x729xf32>
    %c8_55 = arith.constant 8 : index
    %c0_56 = arith.constant 0 : index
    %c0_57 = arith.constant 0 : index
    %56 = vector.load %arg5[%c8_55, %c0_56, %c0_57] : memref<16x16x729xf32, #tpu.memory_space<vmem>>, vector<1x16x729xf32>
    %57 = vector.shape_cast %56 : vector<1x16x729xf32> to vector<16x729xf32>
    %cst_58 = arith.constant dense<0.000000e+00> : vector<2x16xf32>
    %58 = tpu.matmul %55, %57, %cst_58 {dimension_numbers = #tpu.dot_dimension_numbers<[1], [1], [0], [0], [0, 0, 1, 0], [], []>} : vector<2x729xf32>, vector<16x729xf32>, vector<2x16xf32> -> vector<2x16xf32>
    %59 = arith.addf %53, %58 : vector<2x16xf32>
    %c0_59 = arith.constant 0 : index
    %c9 = arith.constant 9 : index
    %c0_60 = arith.constant 0 : index
    %60 = vector.load %arg13[%c0_59, %c9, %c0_60] : memref<2x16x729xf32, #tpu.memory_space<vmem>>, vector<2x1x729xf32>
    %61 = vector.shape_cast %60 : vector<2x1x729xf32> to vector<2x729xf32>
    %c9_61 = arith.constant 9 : index
    %c0_62 = arith.constant 0 : index
    %c0_63 = arith.constant 0 : index
    %62 = vector.load %arg5[%c9_61, %c0_62, %c0_63] : memref<16x16x729xf32, #tpu.memory_space<vmem>>, vector<1x16x729xf32>
    %63 = vector.shape_cast %62 : vector<1x16x729xf32> to vector<16x729xf32>
    %cst_64 = arith.constant dense<0.000000e+00> : vector<2x16xf32>
    %64 = tpu.matmul %61, %63, %cst_64 {dimension_numbers = #tpu.dot_dimension_numbers<[1], [1], [0], [0], [0, 0, 1, 0], [], []>} : vector<2x729xf32>, vector<16x729xf32>, vector<2x16xf32> -> vector<2x16xf32>
    %65 = arith.addf %59, %64 : vector<2x16xf32>
    %c0_65 = arith.constant 0 : index
    %c10 = arith.constant 10 : index
    %c0_66 = arith.constant 0 : index
    %66 = vector.load %arg13[%c0_65, %c10, %c0_66] : memref<2x16x729xf32, #tpu.memory_space<vmem>>, vector<2x1x729xf32>
    %67 = vector.shape_cast %66 : vector<2x1x729xf32> to vector<2x729xf32>
    %c10_67 = arith.constant 10 : index
    %c0_68 = arith.constant 0 : index
    %c0_69 = arith.constant 0 : index
    %68 = vector.load %arg5[%c10_67, %c0_68, %c0_69] : memref<16x16x729xf32, #tpu.memory_space<vmem>>, vector<1x16x729xf32>
    %69 = vector.shape_cast %68 : vector<1x16x729xf32> to vector<16x729xf32>
    %cst_70 = arith.constant dense<0.000000e+00> : vector<2x16xf32>
    %70 = tpu.matmul %67, %69, %cst_70 {dimension_numbers = #tpu.dot_dimension_numbers<[1], [1], [0], [0], [0, 0, 1, 0], [], []>} : vector<2x729xf32>, vector<16x729xf32>, vector<2x16xf32> -> vector<2x16xf32>
    %71 = arith.addf %65, %70 : vector<2x16xf32>
    %c0_71 = arith.constant 0 : index
    %c11 = arith.constant 11 : index
    %c0_72 = arith.constant 0 : index
    %72 = vector.load %arg13[%c0_71, %c11, %c0_72] : memref<2x16x729xf32, #tpu.memory_space<vmem>>, vector<2x1x729xf32>
    %73 = vector.shape_cast %72 : vector<2x1x729xf32> to vector<2x729xf32>
    %c11_73 = arith.constant 11 : index
    %c0_74 = arith.constant 0 : index
    %c0_75 = arith.constant 0 : index
    %74 = vector.load %arg5[%c11_73, %c0_74, %c0_75] : memref<16x16x729xf32, #tpu.memory_space<vmem>>, vector<1x16x729xf32>
    %75 = vector.shape_cast %74 : vector<1x16x729xf32> to vector<16x729xf32>
    %cst_76 = arith.constant dense<0.000000e+00> : vector<2x16xf32>
    %76 = tpu.matmul %73, %75, %cst_76 {dimension_numbers = #tpu.dot_dimension_numbers<[1], [1], [0], [0], [0, 0, 1, 0], [], []>} : vector<2x729xf32>, vector<16x729xf32>, vector<2x16xf32> -> vector<2x16xf32>
    %77 = arith.addf %71, %76 : vector<2x16xf32>
    %c0_77 = arith.constant 0 : index
    %c12 = arith.constant 12 : index
    %c0_78 = arith.constant 0 : index
    %78 = vector.load %arg13[%c0_77, %c12, %c0_78] : memref<2x16x729xf32, #tpu.memory_space<vmem>>, vector<2x1x729xf32>
    %79 = vector.shape_cast %78 : vector<2x1x729xf32> to vector<2x729xf32>
    %c12_79 = arith.constant 12 : index
    %c0_80 = arith.constant 0 : index
    %c0_81 = arith.constant 0 : index
    %80 = vector.load %arg5[%c12_79, %c0_80, %c0_81] : memref<16x16x729xf32, #tpu.memory_space<vmem>>, vector<1x16x729xf32>
    %81 = vector.shape_cast %80 : vector<1x16x729xf32> to vector<16x729xf32>
    %cst_82 = arith.constant dense<0.000000e+00> : vector<2x16xf32>
    %82 = tpu.matmul %79, %81, %cst_82 {dimension_numbers = #tpu.dot_dimension_numbers<[1], [1], [0], [0], [0, 0, 1, 0], [], []>} : vector<2x729xf32>, vector<16x729xf32>, vector<2x16xf32> -> vector<2x16xf32>
    %83 = arith.addf %77, %82 : vector<2x16xf32>
    %c0_83 = arith.constant 0 : index
    %c13 = arith.constant 13 : index
    %c0_84 = arith.constant 0 : index
    %84 = vector.load %arg13[%c0_83, %c13, %c0_84] : memref<2x16x729xf32, #tpu.memory_space<vmem>>, vector<2x1x729xf32>
    %85 = vector.shape_cast %84 : vector<2x1x729xf32> to vector<2x729xf32>
    %c13_85 = arith.constant 13 : index
    %c0_86 = arith.constant 0 : index
    %c0_87 = arith.constant 0 : index
    %86 = vector.load %arg5[%c13_85, %c0_86, %c0_87] : memref<16x16x729xf32, #tpu.memory_space<vmem>>, vector<1x16x729xf32>
    %87 = vector.shape_cast %86 : vector<1x16x729xf32> to vector<16x729xf32>
    %cst_88 = arith.constant dense<0.000000e+00> : vector<2x16xf32>
    %88 = tpu.matmul %85, %87, %cst_88 {dimension_numbers = #tpu.dot_dimension_numbers<[1], [1], [0], [0], [0, 0, 1, 0], [], []>} : vector<2x729xf32>, vector<16x729xf32>, vector<2x16xf32> -> vector<2x16xf32>
    %89 = arith.addf %83, %88 : vector<2x16xf32>
    %c0_89 = arith.constant 0 : index
    %c14 = arith.constant 14 : index
    %c0_90 = arith.constant 0 : index
    %90 = vector.load %arg13[%c0_89, %c14, %c0_90] : memref<2x16x729xf32, #tpu.memory_space<vmem>>, vector<2x1x729xf32>
    %91 = vector.shape_cast %90 : vector<2x1x729xf32> to vector<2x729xf32>
    %c14_91 = arith.constant 14 : index
    %c0_92 = arith.constant 0 : index
    %c0_93 = arith.constant 0 : index
    %92 = vector.load %arg5[%c14_91, %c0_92, %c0_93] : memref<16x16x729xf32, #tpu.memory_space<vmem>>, vector<1x16x729xf32>
    %93 = vector.shape_cast %92 : vector<1x16x729xf32> to vector<16x729xf32>
    %cst_94 = arith.constant dense<0.000000e+00> : vector<2x16xf32>
    %94 = tpu.matmul %91, %93, %cst_94 {dimension_numbers = #tpu.dot_dimension_numbers<[1], [1], [0], [0], [0, 0, 1, 0], [], []>} : vector<2x729xf32>, vector<16x729xf32>, vector<2x16xf32> -> vector<2x16xf32>
    %95 = arith.addf %89, %94 : vector<2x16xf32>
    %c0_95 = arith.constant 0 : index
    %c15 = arith.constant 15 : index
    %c0_96 = arith.constant 0 : index
    %96 = vector.load %arg13[%c0_95, %c15, %c0_96] : memref<2x16x729xf32, #tpu.memory_space<vmem>>, vector<2x1x729xf32>
    %97 = vector.shape_cast %96 : vector<2x1x729xf32> to vector<2x729xf32>
    %c15_97 = arith.constant 15 : index
    %c0_98 = arith.constant 0 : index
    %c0_99 = arith.constant 0 : index
    %98 = vector.load %arg5[%c15_97, %c0_98, %c0_99] : memref<16x16x729xf32, #tpu.memory_space<vmem>>, vector<1x16x729xf32>
    %99 = vector.shape_cast %98 : vector<1x16x729xf32> to vector<16x729xf32>
    %cst_100 = arith.constant dense<0.000000e+00> : vector<2x16xf32>
    %100 = tpu.matmul %97, %99, %cst_100 {dimension_numbers = #tpu.dot_dimension_numbers<[1], [1], [0], [0], [0, 0, 1, 0], [], []>} : vector<2x729xf32>, vector<16x729xf32>, vector<2x16xf32> -> vector<2x16xf32>
    %101 = arith.addf %95, %100 : vector<2x16xf32>
    %c0_101 = arith.constant 0 : index
    %c0_102 = arith.constant 0 : index
    %102 = vector.load %arg6[%c0_101, %c0_102] : memref<1x16xf32, #tpu.memory_space<vmem>>, vector<1x16xf32>
    %103 = vector.broadcast %102 : vector<1x16xf32> to vector<2x16xf32>
    %104 = arith.addf %101, %103 : vector<2x16xf32>
    %cst_103 = arith.constant 0.000000e+00 : f32
    %105 = vector.broadcast %cst_103 : f32 to vector<2x16xf32>
    %106 = arith.maximumf %104, %105 : vector<2x16xf32>
    %c0_104 = arith.constant 0 : index
    %c0_105 = arith.constant 0 : index
    %c0_106 = arith.constant 0 : index
    %c0_107 = arith.constant 0 : index
    %107 = vector.load %arg11[%c0_104, %c0_105, %c0_106, %c0_107] : memref<1x1x2x16xf32, #tpu.memory_space<vmem>>, vector<1x1x2x16xf32>
    %108 = vector.shape_cast %107 : vector<1x1x2x16xf32> to vector<2x16xf32>
    %109 = vector.shape_cast %106 : vector<2x16xf32> to vector<1x1x2x16xf32>
    tpu.vector_store %arg11[%c0_104, %c0_105, %c0_106, %c0_107], %109 {strides = array<i32>} : memref<1x1x2x16xf32, #tpu.memory_space<vmem>>, vector<1x1x2x16xf32>,
    %c0_108 = arith.constant 0 : index
    %c0_109 = arith.constant 0 : index
    %110 = vector.load %arg7[%c0_108, %c0_109] : memref<2x16xf32, #tpu.memory_space<vmem>>, vector<2x16xf32>
    %cst_110 = arith.constant dense<0.000000e+00> : vector<2x2xf32>
    %111 = tpu.matmul %106, %110, %cst_110 {dimension_numbers = #tpu.dot_dimension_numbers<[1], [1], [0], [0], [0, 0, 1, 0], [], []>} : vector<2x16xf32>, vector<2x16xf32>, vector<2x2xf32> -> vector<2x2xf32>
    %c0_111 = arith.constant 0 : index
    %c0_112 = arith.constant 0 : index
    %112 = vector.load %arg8[%c0_111, %c0_112] : memref<1x2xf32, #tpu.memory_space<vmem>>, vector<1x2xf32>
    %113 = vector.broadcast %112 : vector<1x2xf32> to vector<2x2xf32>
    %114 = arith.addf %111, %113 : vector<2x2xf32>
    %c0_113 = arith.constant 0 : index
    %c0_114 = arith.constant 0 : index
    %c0_115 = arith.constant 0 : index
    %c0_116 = arith.constant 0 : index
    %115 = vector.load %arg12[%c0_113, %c0_114, %c0_115, %c0_116] : memref<1x1x2x2xf32, #tpu.memory_space<vmem>>, vector<1x1x2x2xf32>
    %116 = vector.shape_cast %115 : vector<1x1x2x2xf32> to vector<2x2xf32>
    %117 = vector.shape_cast %114 : vector<2x2xf32> to vector<1x1x2x2xf32>
    tpu.vector_store %arg12[%c0_113, %c0_114, %c0_115, %c0_116], %117 {strides = array<i32>} : memref<1x1x2x2xf32, #tpu.memory_space<vmem>>, vector<1x1x2x2xf32>,
    return
  }
  func.func @transform_0(%arg0: i32, %arg1: i32) -> (i32, i32, i32, i32) {
    %c0_i32 = arith.constant 0 : i32
    %c0_i32_0 = arith.constant 0 : i32
    %c0_i32_1 = arith.constant 0 : i32
    return %arg0, %arg1, %c0_i32, %c0_i32_0 : i32, i32, i32, i32
  }
  func.func @transform_1(%arg0: i32, %arg1: i32) -> (i32, i32) {
    %c0_i32 = arith.constant 0 : i32
    %c0_i32_0 = arith.constant 0 : i32
    %c0_i32_1 = arith.constant 0 : i32
    return %c0_i32, %c0_i32_0 : i32, i32
  }
  func.func @transform_2(%arg0: i32, %arg1: i32) -> (i32, i32) {
    %c0_i32 = arith.constant 0 : i32
    %c0_i32_0 = arith.constant 0 : i32
    %c0_i32_1 = arith.constant 0 : i32
    return %c0_i32, %c0_i32_0 : i32, i32
  }
  func.func @transform_3(%arg0: i32, %arg1: i32) -> (i32, i32, i32) {
    %c0_i32 = arith.constant 0 : i32
    %c0_i32_0 = arith.constant 0 : i32
    %c0_i32_1 = arith.constant 0 : i32
    %c0_i32_2 = arith.constant 0 : i32
    return %c0_i32, %c0_i32_0, %c0_i32_1 : i32, i32, i32
  }
  func.func @transform_4(%arg0: i32, %arg1: i32) -> (i32, i32) {
    %c0_i32 = arith.constant 0 : i32
    %c0_i32_0 = arith.constant 0 : i32
    %c0_i32_1 = arith.constant 0 : i32
    return %c0_i32, %c0_i32_0 : i32, i32
  }
  func.func @transform_5(%arg0: i32, %arg1: i32) -> (i32, i32) {
    %c0_i32 = arith.constant 0 : i32
    %c0_i32_0 = arith.constant 0 : i32
    %c0_i32_1 = arith.constant 0 : i32
    return %c0_i32, %c0_i32_0 : i32, i32
  }
  func.func @transform_6(%arg0: i32, %arg1: i32) -> (i32, i32) {
    %c0_i32 = arith.constant 0 : i32
    %c0_i32_0 = arith.constant 0 : i32
    %c0_i32_1 = arith.constant 0 : i32
    return %c0_i32, %c0_i32_0 : i32, i32
  }
  func.func @transform_7(%arg0: i32, %arg1: i32) -> (i32, i32, i32, i32) {
    %c0_i32 = arith.constant 0 : i32
    %c0_i32_0 = arith.constant 0 : i32
    %c0_i32_1 = arith.constant 0 : i32
    return %arg0, %arg1, %c0_i32, %c0_i32_0 : i32, i32, i32, i32
  }
  func.func @transform_8(%arg0: i32, %arg1: i32) -> (i32, i32, i32, i32) {
    %c0_i32 = arith.constant 0 : i32
    %c0_i32_0 = arith.constant 0 : i32
    %c0_i32_1 = arith.constant 0 : i32
    return %arg0, %arg1, %c0_i32, %c0_i32_0 : i32, i32, i32, i32
  }
  func.func @transform_9(%arg0: i32, %arg1: i32) -> (i32, i32, i32, i32) {
    %c0_i32 = arith.constant 0 : i32
    %c0_i32_0 = arith.constant 0 : i32
    %c0_i32_1 = arith.constant 0 : i32
    return %arg0, %arg1, %c0_i32, %c0_i32_0 : i32, i32, i32, i32
  }
  func.func @transform_10(%arg0: i32, %arg1: i32) -> (i32, i32, i32, i32) {
    %c0_i32 = arith.constant 0 : i32
    %c0_i32_0 = arith.constant 0 : i32
    %c0_i32_1 = arith.constant 0 : i32
    return %arg0, %arg1, %c0_i32, %c0_i32_0 : i32, i32, i32, i32
  }
}

</mosaic_0001>

<bundles_post_ra>
// kernel: mnet_forward.1
= control target key start
LH: loop header
LB: loop body
LE: loop exit
PB: predicated region body
PF: predicated region fallthrough
CT: control target
= control target key end

     0   :  { %s5511_s0 = inlined_call_operand.vmem [shape: bf16[2,8,72,729], index: 0, kind: input, shape index: {}]   ;;  %s5512_s1 = inlined_call_operand.vmem [shape: bf16[16,72], index: 1, kind: input, shape index: {}]   ;;  %s5513_s2 = inlined_call_operand.vmem [shape: f32[16,1], index: 2, kind: input, shape index: {}]   ;;  %s5514_s3 = inlined_call_operand.vmem [shape: f32[16,16,729], index: 3, kind: input, shape index: {}]   ;;  %s5515_s4 = inlined_call_operand.vmem [shape: f32[1,16], index: 4, kind: input, shape index: {}]   ;;  %s5516_s5 = inlined_call_operand.vmem [shape: f32[2,16], index: 5, kind: input, shape index: {}]   ;;  %s5517_s6 = inlined_call_operand.vmem [shape: f32[1,2], index: 6, kind: input, shape index: {}]   ;;  %s5518_s7 = inlined_call_operand.vmem [shape: bf16[2,8,16,729], index: 7, kind: output, shape index: {0}]   ;;  %s5519_s8 = inlined_call_operand.vmem [shape: bf16[2,8,16,729], index: 8, kind: output, shape index: {1}]   ;;  %s5520_s9 = inlined_call_operand.hbm [shape: f32[2,4,2,16], index: 9, kind: output, shape index: {2}]   ;;  %s5521_s10 = inlined_call_operand.vmem [shape: f32[2,4,2,2], index: 10, kind: output, shape index: {3}]  }
   0x1   :  { %5536 = sst [smem:[#allocation17_spill]] %s5513_s2 }
   0x2   :  { %5537 = sst [smem:[#allocation18_spill]] %s5517_s6 }
   0x3   :  { %5538 = sst [smem:[#allocation19_spill]] %s5520_s9 }
   0x4   :  { %16 = vsyncpa [#allocation4], 0 }
   0x5   :  { %18 = vsyncpa [#allocation4 + $0x1], 0  ;;  %s4419_s13 = smov 0   ;;  %s4421_s14 = smov 0  }
   0x6   :  { %s4423_s15 = smov 0   ;;  %s4425_s16 = smov 0  }
   0x7   :  { %s4427_s17 = smov 0   ;;  %s4429_s18 = smov 0  }
   0x8   :  { %s4431_s19 = smov 0   ;;  %s4433_s20 = smov 0  }
   0x9 LB: > { %5539 = sst [smem:[#allocation6_spill]] %s4329_s13  ;;  %s3784_s21 = sadd.s32 4294967295, %s4357_s20   ;;  %s4357_s20 = sphi %s4433_s20, %s24_s20   ;;  %s4353_s19 = sphi %s4431_s19, %s5569_s19   ;;  %s4349_s18 = sphi %s4429_s18, %s5568_s18   ;;  %s4345_s17 = sphi %s4427_s17, %s5567_s17   ;;  %s4341_s16 = sphi %s4425_s16, %s5566_s16   ;;  %s4337_s15 = sphi %s4423_s15, %s5565_s15   ;;  %s4333_s14 = sphi %s4421_s14, %s5564_s14   ;;  %s4329_s13 = sphi %s4419_s13, %s5563_s13  }
   0xa   : > { %5540 = sst [smem:[#allocation7_spill]] %s4333_s14  ;;  %s3785_s22 = sadd.s32 4294967294, %s4357_s20  }
   0xb   : > { %5541 = sst [smem:[#allocation8_spill]] %s4337_s15  ;;  %s33_s23 = sadd.s32 1, %s4349_s18 }
   0xc   : > { %5542 = sst [smem:[#allocation9_spill]] %s4349_s18  ;;  %p34_p0 = scmp.ge.s32.totalorder %s33_s23, 4 }
   0xd   : > { %5543 = sst [smem:[#allocation10_spill]] %s4353_s19  ;;  %s36_s24 = sadd.s32 1, %s4353_s19 }
   0xe   : > { %5544 = sst [smem:[#allocation11_spill]] %s4357_s20  ;;  %p265_p1 = scmp.ne.s32.totalorder %s4337_s15, %s4333_s14 }
   0xf   : > { %p266_p2 = scmp.eq.s32.totalorder %s3784_s21, 7  ;;  %s5571_s23 = smov (%p34_p0, %s33_s23), 0 }
  0x10   : > { %5545 = sst [smem:[#allocation12_spill]] %s5571_s23  ;;  %s5573_s24 = smov (!%p34_p0, %s36_s24), %s4353_s19 }
  0x11   : > { %s251_s25 = ssub.s32 %s4349_s18, %s5571_s23  ;;  %p4470_p3 = por %p266_p2, %p265_p1 }
  0x12   : > { %p38_p4 = scmp.ge.s32.totalorder %s5573_s24, 2  ;;  %p271_p5 = scmp.ne.s32.totalorder %s4333_s14, %s4329_s13 }
  0x13   : > { %s5546_s26 = scalar_select %p4470_p3, 1, 0 }
  0x14   : > { %p272_p6 = scmp.eq.s32.totalorder %s3785_s22, 7  ;;  %p3788_p7 = scmp.ge.s32.totalorder %s4357_s20, 1 }
  0x15   : > { %5547 = sst [smem:[#allocation13_spill]] %s5546_s26  ;;  %s5575_s24 = smov (%p38_p4, %s5573_s24), 0 }
  0x16   : > { %5548 = sst [smem:[#allocation14_spill]] %s5575_s24  ;;  %p4479_p8 = por %p272_p6, %p271_p5 }
  0x17   : > { %p350_p9 = scmp.lt.s32.totalorder %s4357_s20, 9  ;;  %s250_s28 = ssub.s32 %s4353_s19, %s5575_s24 }
  0x18   : > { %s5549_s27 = scalar_select %p4479_p8, 1, 0 }
  0x19   : > { %s255_s29 = sadd.s32 1, %s4337_s15  ;;  %s252_s30 = sor.u32 %s251_s25, %s250_s28 }
  0x1a   : > { %5550 = sst [smem:[#allocation15_spill]] %s5549_s27  ;;  %p351_p10 = pnand %p3788_p7, %p350_p9 }
  0x1b   : > { %p253_p11 = scmp.eq.s32.totalorder %s252_s30, 0  ;;  %s5552_s2 = sld [smem:[#allocation17_spill]] (!%p351_p10) }
  0x1c   : > { %354 = sbr.rel (%p351_p10) target bundleno = 826 (0x33a), region = 48  ;;  %s5526_s22 = sand.u32 (!%p351_p10), 1, %s4333_s14  }
  0x1d   : > { %s4488_s11 = scalar_select %p253_p11, %s4337_s15, %s255_s29  }
  0x1e   : > { %s3790_s23 = sshll.u32 (!%p351_p10), %s4341_s16, 1  ;;  %s4497_s25 = sshll.u32 (!%p351_p10), %s5526_s22, 1 }
  0x1f   : > { %5551 = sst [smem:[#allocation16_spill]] %s4488_s11  ;;  %p422_p12 = scmp.lt.s32.totalorder (!%p351_p10), %s4345_s17, 1 }
  0x20   : > { %p424_p13 = scmp.lt.s32.totalorder (!%p351_p10), %s3790_s23, 7  ;;  %p456_p0 = scmp.lt.s32.totalorder (!%p351_p10), %s4341_s16, 3 }
  0x21   : > { %v465_v0 = vld [vmem:[%s5552_s2] sm:$0xff]  ;;  %v4363_v1 = vmov 0   ;;  %s423_s28 = scalar_select %p422_p12, %s4345_s17, 1  ;;  %v466_v2 = vld [vmem:[%s5552_s2 + $0x8] sm:$0xff] }
  0x22   : > { %4256 = vset.pattern.permute.xlu0 %v4363_v1  ;;  %s5577_s23 = smov (!%p424_p13, %s3790_s23), 7  ;;  %v4529_v3 = vld [vmem:[%s5512_s1] sm:$0xf]  ;;  %v4534_v4 = vld [vmem:[%s5512_s1] sm:$0xf0] }
  0x23   : > { %469 = vperm.xlu0 %4256, %v465_v0   ;;  %s4173_s29 = smul.u32 432, %s423_s28  ;;  %s3796_s6 = sshll.u32 %s423_s28, 2 }
  0x24   : > { %s4172_s30 = smul.u32 54, %s5577_s23 }
  0x25   : > { %s4174_s24 = smul.u32 12, %s5577_s23 }
  0x26   : > { %s428_s19 = sadd.s32 %s4173_s29, %s4172_s30  ;;  %s4175_s18 = smul.u32 96, %s423_s28 }
  0x27   : > { %s3791_s11 = sshll.u32 %s428_s19, 2 }
  0x28   : > { %s4508_s27 = scalar_lea.vmem %s5511_s0, %s3791_s11  ;;  %s439_s13 = sadd.s32 %s4175_s18, %s4174_s24 }
  0x29   : > { %s3793_s20 = sshll.u32 %s439_s13, 2 }
  0x2a   : > { %s4513_s12 = scalar_lea.vmem %s5518_s7, %s3793_s20  ;;  %s4518_s19 = scalar_lea.vmem %s5519_s8, %s3793_s20 }
  0x2b   : > { %474 = vperm.xlu0 %4256, %v466_v2   ;;  %s457_s30 = scalar_select %p456_p0, %s4341_s16, 3 }
  0x2c   : > { %s4541_s20 = smov 0  }
  0x2d   : > { %s459_s21 = sadd.s32 %s3796_s6, %s457_s30  ;;  %s410_s6 = scalar_lea.vmem [#allocation3], %s4497_s25 }
  0x2e   : > { %s3797_s2 = sshll.u32 %s459_s21, 1 }
  0x2f   : > { %s4524_s11 = scalar_lea.vmem %s5521_s10, %s3797_s2 }
  0x95   : > { %v4536_v5 = vpop.permute.xlu0 %469 }
  0x9d   : > { %v4538_v6 = vpop.permute.xlu0 %474 }
  0x9e LB: >> { %s4144_s2 = smul.u32 216, %s4361_s20  ;;  %vm657_vm0 = vcmask 1043456   ;;  %vm653_vm1 = vcmask 588800   ;;  %vm783_vm2 = vcmask 728068   ;;  %vm810_vm4 = vcmask 728064   ;;  %s4361_s20 = sphi %s4541_s20, %s482_s20  }
  0x9f   : >> { %s4171_s26 = smul.u32 96, %s4361_s20  ;;  %vm4651_vm3 = vmor %vm783_vm2, %vm657_vm0 }
  0xa0   : >> { %s4548_s14 = scalar_lea.vmem %s4508_s27, %s4144_s2  ;;  %s4169_s22 = smul.u32 48, %s4361_s20 }
  0xa1   : >> { %v510_v7 = vld [vmem:[%s4548_s14 + $0xc0] sm:$0xff]  ;;  %v511_v8 = vld [vmem:[%s4548_s14 + $0xc8] sm:$0xff]  ;;  %v3877_v13 = vld [vmem:[%s4548_s14 + $0x90] sm:$0xf]  ;;  %s4625_s29 = scalar_lea.vmem [#allocation2], %s4171_s26  ;;  %s482_s20 = sadd.s32 1, %s4361_s20  }
  0xa2   : >> { %v593_v9 = vunpack.c.l.b16 %v510_v7  ;;  %v594_v10 = vunpack.c.h.b16 %v510_v7  ;;  %v595_v11 = vunpack.c.l.b16 %v511_v8  ;;  %v596_v12 = vunpack.c.h.b16 %v511_v8  ;;  %v4166_v14 = vld [vmem:[%s4548_s14 + $0xa4] sm:$0xf0]  ;;  %v4163_v19 = vld [vmem:[%s4548_s14 + $0x94] sm:$0xf]  ;;  %v3879_v20 = vld [vmem:[%s4548_s14 + $0xa8] sm:$0xf0]  ;;  %s4620_s28 = scalar_lea.vmem %s4513_s12, %s4169_s22  ;;  %s4623_s23 = scalar_lea.vmem %s4518_s19, %s4169_s22 }
  0xa3   : >> { %v3885_v21 = vld [vmem:[%s4548_s14 + $0x98] sm:$0xf]  ;;  %v4167_v22 = vld [vmem:[%s4548_s14 + $0xac] sm:$0xf0]  ;;  %v4164_v23 = vld [vmem:[%s4548_s14 + $0x9c] sm:$0xf]  ;;  %v3878_v29 = vor.u32 %v4166_v14, %v3877_v13  ;;  %v3882_v30 = vor.u32 %v4163_v19, %v3879_v20  ;;  %v3802_v20 = vor.u32 %v4534_v4, %v4529_v3 }
  0xa4   : >> { %v623_v15 = vpack.c.b16 %v593_v9, %v593_v9  ;;  %v624_v16 = vpack.c.b16 %v594_v10, %v594_v10  ;;  %v625_v17 = vpack.c.b16 %v595_v11, %v595_v11  ;;  %v626_v18 = vpack.c.b16 %v596_v12, %v596_v12  ;;  %v3887_v24 = vld [vmem:[%s4548_s14 + $0xb0] sm:$0xf0]  ;;  %v3853_v31 = vld [vmem:[%s4548_s14 + $0x60] sm:$0xf]  ;;  %v4160_v32 = vld [vmem:[%s4548_s14 + $0x74] sm:$0xf0] }
  0xa5   : >> { %v3886_v33 = vor.u32 %v4167_v22, %v3885_v21  ;;  %v3890_v34 = vor.u32 %v4164_v23, %v3887_v24  ;;  %v4157_v35 = vld [vmem:[%s4548_s14 + $0x64] sm:$0xf]  ;;  %v3855_v36 = vld [vmem:[%s4548_s14 + $0x78] sm:$0xf0]  ;;  %v3861_v37 = vld [vmem:[%s4548_s14 + $0x68] sm:$0xf]  ;;  %v3854_v41 = vor.u32 %v4160_v32, %v3853_v31 }
  0xa6   : >> { %v659_v25 = vsel %vm657_vm0, %v623_v15, 0  ;;  %v662_v26 = vsel %vm657_vm0, %v624_v16, 0  ;;  %v665_v27 = vsel %vm657_vm0, %v625_v17, 0  ;;  %v668_v28 = vsel %vm657_vm0, %v626_v18, 0  ;;  %v4161_v38 = vld [vmem:[%s4548_s14 + $0x7c] sm:$0xf0] }
  0xa7   : >> { %679 = vmatpush.bf16.msra.mxu0 %v659_v25  ;;  %693 = vmatpush.bf16.msra.mxu1 %v662_v26  ;;  %v4158_v39 = vld [vmem:[%s4548_s14 + $0x6c] sm:$0xf]  ;;  %v3863_v40 = vld [vmem:[%s4548_s14 + $0x80] sm:$0xf0]  ;;  %v3858_v42 = vor.u32 %v4157_v35, %v3855_v36  ;;  %v3829_v43 = vld [vmem:[%s4548_s14 + $0x30] sm:$0xf]  ;;  %v3862_v46 = vor.u32 %v4161_v38, %v3861_v37 }
  0xa8   : >> { %707 = vmatpush.bf16.msra.mxu2 %v665_v27  ;;  %721 = vmatpush.bf16.msra.mxu3 %v668_v28  ;;  %v4154_v44 = vld [vmem:[%s4548_s14 + $0x44] sm:$0xf0]  ;;  %v512_v45 = vld [vmem:[%s4548_s14 + $0xd0] sm:$0xff]  ;;  %v3866_v47 = vor.u32 %v4158_v39, %v3863_v40  ;;  %v3831_v49 = vld [vmem:[%s4548_s14 + $0x48] sm:$0xf0]  ;;  %p479_p1 = scmp.ge.s32.totalorder %s482_s20, 2  }
  0xa9   : >> { %v4151_v48 = vld [vmem:[%s4548_s14 + $0x34] sm:$0xf]  ;;  %v3837_v50 = vld [vmem:[%s4548_s14 + $0x38] sm:$0xf]  ;;  %v4155_v51 = vld [vmem:[%s4548_s14 + $0x4c] sm:$0xf0]  ;;  %v597_v54 = vunpack.c.l.b16 %v512_v45  ;;  %v598_v55 = vunpack.c.h.b16 %v512_v45  ;;  %v3830_v56 = vor.u32 %v4154_v44, %v3829_v43 }
  0xaa   : >> { %v4152_v52 = vld [vmem:[%s4548_s14 + $0x3c] sm:$0xf]  ;;  %v3839_v53 = vld [vmem:[%s4548_s14 + $0x50] sm:$0xf0]  ;;  %v3834_v57 = vor.u32 %v4151_v48, %v3831_v49  ;;  %v3805_v58 = vld [vmem:[%s4548_s14] sm:$0xf]  ;;  %v3838_v59 = vor.u32 %v4155_v51, %v3837_v50 }
  0xab   : >> { %680 = vmatpush.bf16.msra.mxu0 %v3878_v29  ;;  %694 = vmatpush.bf16.msra.mxu1 %v3882_v30  ;;  %v3842_v60 = vor.u32 %v4152_v52, %v3839_v53  ;;  %v4148_v61 = vld [vmem:[%s4548_s14 + $0x14] sm:$0xf0]  ;;  %v4145_v62 = vld [vmem:[%s4548_s14 + $0x4] sm:$0xf]  ;;  %v3807_v63 = vld [vmem:[%s4548_s14 + $0x18] sm:$0xf0]  ;;  %v627_v0 = vpack.c.b16 %v597_v54, %v597_v54  ;;  %v628_v1 = vpack.c.b16 %v598_v55, %v598_v55 }
  0xac   : >> { %708 = vmatpush.bf16.msra.mxu2 %v3886_v33  ;;  %722 = vmatpush.bf16.msra.mxu3 %v3890_v34  ;;  %v3813_v2 = vld [vmem:[%s4548_s14 + $0x8] sm:$0xf]  ;;  %v4149_v7 = vld [vmem:[%s4548_s14 + $0x1c] sm:$0xf0]  ;;  %v4146_v8 = vld [vmem:[%s4548_s14 + $0xc] sm:$0xf]  ;;  %v3806_v10 = vor.u32 %v4148_v61, %v3805_v58  ;;  %v3810_v11 = vor.u32 %v4145_v62, %v3807_v63 }
  0xad   : >> { %v3815_v9 = vld [vmem:[%s4548_s14 + $0x20] sm:$0xf0]  ;;  %v3893_v12 = vld [vmem:[%s4548_s14 + $0xa0] sm:$0xf]  ;;  %v4168_v13 = vld [vmem:[%s4548_s14 + $0xb4] sm:$0xf0]  ;;  %v3814_v16 = vor.u32 %v4149_v7, %v3813_v2 }
  0xae   : >> { %v671_v14 = vsel %vm657_vm0, %v627_v0, 0  ;;  %v674_v15 = vsel %vm657_vm0, %v628_v1, 0  ;;  %v3818_v17 = vor.u32 %v4146_v8, %v3815_v9  ;;  %v4165_v18 = vld [vmem:[%s4548_s14 + $0xa4] sm:$0xf]  ;;  %v3895_v19 = vld [vmem:[%s4548_s14 + $0xb8] sm:$0xf0]  ;;  %v3894_v21 = vor.u32 %v4168_v13, %v3893_v12 }
  0xaf   : >> { %681 = vmatpush.bf16.msra.mxu0 %v3854_v41  ;;  %695 = vmatpush.bf16.msra.mxu1 %v3858_v42  ;;  %v3898_v22 = vor.u32 %v4165_v18, %v3895_v19  ;;  %v3869_v23 = vld [vmem:[%s4548_s14 + $0x70] sm:$0xf]  ;;  %v4162_v24 = vld [vmem:[%s4548_s14 + $0x84] sm:$0xf0]  ;;  %v4159_v25 = vld [vmem:[%s4548_s14 + $0x74] sm:$0xf] }
  0xb0   : >> { %709 = vmatpush.bf16.msra.mxu2 %v3862_v46  ;;  %723 = vmatpush.bf16.msra.mxu3 %v3866_v47  ;;  %v3871_v26 = vld [vmem:[%s4548_s14 + $0x88] sm:$0xf0]  ;;  %v3870_v27 = vor.u32 %v4162_v24, %v3869_v23  ;;  %v3845_v29 = vld [vmem:[%s4548_s14 + $0x40] sm:$0xf]  ;;  %v4156_v30 = vld [vmem:[%s4548_s14 + $0x54] sm:$0xf0] }
  0xb1   : >> { %v3874_v28 = vor.u32 %v4159_v25, %v3871_v26  ;;  %v4153_v31 = vld [vmem:[%s4548_s14 + $0x44] sm:$0xf]  ;;  %v3847_v32 = vld [vmem:[%s4548_s14 + $0x58] sm:$0xf0]  ;;  %v3846_v33 = vor.u32 %v4156_v30, %v3845_v29  ;;  %v3821_v35 = vld [vmem:[%s4548_s14 + $0x10] sm:$0xf] }
  0xb2   : >> { %v3850_v34 = vor.u32 %v4153_v31, %v3847_v32  ;;  %v4150_v36 = vld [vmem:[%s4548_s14 + $0x24] sm:$0xf0]  ;;  %v4147_v37 = vld [vmem:[%s4548_s14 + $0x14] sm:$0xf]  ;;  %v3823_v38 = vld [vmem:[%s4548_s14 + $0x28] sm:$0xf0] }
  0xb3   : >> { %682 = vmatpush.bf16.msra.mxu0 %v3830_v56  ;;  %696 = vmatpush.bf16.msra.mxu1 %v3834_v57  ;;  %v3822_v39 = vor.u32 %v4150_v36, %v3821_v35  ;;  %v3826_v40 = vor.u32 %v4147_v37, %v3823_v38  ;;  %v3914_v30 = vld [vmem:[%s5514_s3 + $0x90] sm:$0xff] (%p479_p1)  ;;  %v3916_v31 = vld [vmem:[%s5514_s3 + $0xa0] sm:$0xff] (%p479_p1)  ;;  %v3917_v32 = vld [vmem:[%s5514_s3 + $0xa8] sm:$0xff] (%p479_p1)  ;;  %vm3484_vm5 = vcmask (%p479_p1), 130048   ;;  %s5555_s27 = sld [smem:[#allocation7_spill]] (%p479_p1)  ;;  %s4139_s12 = sshll.u32 (%p479_p1), %s4345_s17, 2 }
  0xb4   : >> { %710 = vmatpush.bf16.msra.mxu2 %v3838_v59  ;;  %724 = vmatpush.bf16.msra.mxu3 %v3842_v60  ;;  %v3908_v3 = vld [vmem:[%s5514_s3 + $0x60] sm:$0xff] (%p479_p1)  ;;  %v3910_v4 = vld [vmem:[%s5514_s3 + $0x70] sm:$0xff] (%p479_p1)  ;;  %s3560_s19 = sadd.s32 (%p479_p1), %s4341_s16, %s4139_s12  ;;  %vm3477_vm6 = vcmask (%p479_p1), 123904   ;;  %s3564_s21 = sshll.u32 (%p479_p1), %s410_s6, 4  ;;  %s3565_s21 = int_to_ptr.vmem [resolvable:$true] %s3564_s21 }
  0xb5   : > { %s4140_s22 = sshll.u32 (%p479_p1), %s3560_s19, 1 }
  0xb7   : >> { %683 = vmatpush.bf16.msra.mxu0 %v3806_v10  ;;  %697 = vmatpush.bf16.msra.mxu1 %v3810_v11 }
  0xb8   : >> { %711 = vmatpush.bf16.msra.mxu2 %v3814_v16  ;;  %725 = vmatpush.bf16.msra.mxu3 %v3818_v17 }
  0xb9   : > { %s5558_s17 = sand.u32 (%p479_p1), 1, %s5555_s27  }
  0xba   : >> { %3899 = vmatmul.msk.bf16.vlgmr.msra.gmra.mxu0 %vm653_vm1, %v3802_v20  ;;  %3900 = vmatmul.msk.bf16.vlgmr.msra.gmra.mxu1 %vm653_vm1, %v3802_v20  ;;  %s3534_s16 = scalar_lea.sflag (%p479_p1), [#allocation4], %s5558_s17 }
  0xbb   : >> { %735 = vmatpush.bf16.msrb.mxu0 %v671_v14  ;;  %749 = vmatpush.bf16.msrb.mxu1 %v674_v15 }
  0xbc   : >> { %3901 = vmatmul.msk.bf16.vlgmr.msra.gmra.mxu2 %vm653_vm1, %v3802_v20  ;;  %3902 = vmatmul.msk.bf16.vlgmr.msra.gmra.mxu3 %vm653_vm1, %v3802_v20 }
  0xbd   : > { %937 = vmatpush.xpose.msra.mxu2 (%p479_p1), %v3916_v31  ;;  %957 = vmatpush.xpose.msra.mxu3 (%p479_p1), %v3917_v32 }
  0xbf   : >> { %736 = vmatpush.bf16.msrb.mxu0 %v3894_v21  ;;  %750 = vmatpush.bf16.msrb.mxu1 %v3898_v22 }
  0xc1   : > { %938 = vmatpush.xpose.msra.mxu2 (%p479_p1), %v3910_v4  ;;  %v3937_v4 = vld [vmem:[%s5514_s3 + $0x118] sm:$0xff] (%p479_p1) }
  0xc3   : >> { %737 = vmatpush.bf16.msrb.mxu0 %v3870_v27  ;;  %751 = vmatpush.bf16.msrb.mxu1 %v3874_v28 }
  0xc7   : >> { %738 = vmatpush.bf16.msrb.mxu0 %v3846_v33  ;;  %752 = vmatpush.bf16.msrb.mxu1 %v3850_v34  ;;  %v3915_v33 = vld [vmem:[%s5514_s3 + $0x98] sm:$0xff] (%p479_p1) }
  0xcb   : >> { %739 = vmatpush.bf16.msrb.mxu0 %v3822_v39  ;;  %753 = vmatpush.bf16.msrb.mxu1 %v3826_v40  ;;  %v831_v39 = vld [vmem:[%s5514_s3 + $0x30] sm:$0xff] (%p479_p1) }
  0xcc   : > { %v3918_v40 = vld [vmem:[%s5514_s3 + $0xb0] sm:$0xff] (%p479_p1)  ;;  %1041 = vmatpush.xpose.msrb.mxu2 (%p479_p1), %v831_v39 }
  0xce   : >> { %3903 = vmatmul.msk.bf16.vlgmr.msrb.gmra.mxu0 %vm653_vm1, %v3802_v20  ;;  %3904 = vmatmul.msk.bf16.vlgmr.msrb.gmra.mxu1 %vm653_vm1, %v3802_v20 }
  0xcf   : > { %897 = vmatpush.xpose.msra.mxu0 (%p479_p1), %v3914_v30  ;;  %917 = vmatpush.xpose.msra.mxu1 (%p479_p1), %v3915_v33  ;;  %v3947_v33 = vld [vmem:[%s5514_s3 + $0x150] sm:$0xff] (%p479_p1) }
  0xd3   : > { %898 = vmatpush.xpose.msra.mxu0 (%p479_p1), %v3908_v3  ;;  %v3948_v3 = vld [vmem:[%s5514_s3 + $0x158] sm:$0xff] (%p479_p1) }
  0xd7   : > { %977 = vmatpush.xpose.msrb.mxu0 (%p479_p1), %v3918_v40 }
 0x137   : >> { %v685_v41 = vpop.f32.mrf.mxu0  ;;  %v699_v42 = vpop.f32.mrf.mxu1 }
 0x138   : >> { %v686_v43 = vadd.f32 %v685_v41, %v4536_v5  ;;  %v700_v44 = vadd.f32 %v699_v42, %v4536_v5  ;;  %v832_v42 = vld [vmem:[%s5514_s3 + $0x38] sm:$0xff] (%p479_p1) }
 0x13a   : >> { %v760_v45 = vmax.f32 %v686_v43, 0.0  ;;  %v761_v46 = vmax.f32 %v700_v44, 0.0  ;;  %v772_v47 = vpack.c.bf16 %v700_v44, %v686_v43  ;;  %v3919_v43 = vld [vmem:[%s5514_s3 + $0xb8] sm:$0xff] (%p479_p1)  ;;  %v825_v44 = vld [vmem:[%s5514_s3] sm:$0xff] (%p479_p1) }
 0x13b   : > { %1042 = vmatpush.xpose.msrb.mxu2 (%p479_p1), %v825_v44  ;;  %v3949_v44 = vld [vmem:[%s5514_s3 + $0x160] sm:$0xff] (%p479_p1) }
 0x13c   : >> { %805 = vst [vmem:[%s4625_s29] sm:$0xff] %v760_v45  ;;  %v789_v48 = vpack.c.bf16 %v761_v46, %v760_v45  ;;  %v3912_v45 = vld [vmem:[%s5514_s3 + $0x80] sm:$0xff] (%p479_p1) }
 0x13d   : >> { %781 = vst [vmem:[%s4620_s28] sm:$0xff] %v772_v47  ;;  %v3913_v47 = vld [vmem:[%s5514_s3 + $0x88] sm:$0xff] (%p479_p1)  ;;  %978 = vmatpush.xpose.msrb.mxu0 (%p479_p1), %v3912_v45  ;;  %v3951_v45 = vld [vmem:[%s5514_s3 + $0x170] sm:$0xff] (%p479_p1) }
 0x13e   : >> { %797 = vst [vmem:[%s4623_s23] sm:$0xff] %v789_v48 }
 0x13f   : >> { %806 = vst [vmem:[%s4625_s29 + $0x8] sm:$0xff] %v761_v46  ;;  %v687_v49 = vpop.f32.mrf.mxu0  ;;  %v701_v50 = vpop.f32.mrf.mxu1  ;;  %v826_v46 = vld [vmem:[%s5514_s3 + $0x8] sm:$0xff] (%p479_p1) }
 0x140   : >> { %v688_v51 = vadd.f32 %v687_v49, %v4538_v6  ;;  %v702_v52 = vadd.f32 %v701_v50, %v4538_v6  ;;  %v713_v53 = vpop.f32.mrf.mxu2  ;;  %v727_v54 = vpop.f32.mrf.mxu3 }
 0x141   : >> { %v714_v55 = vadd.f32 %v713_v53, %v4536_v5  ;;  %v728_v56 = vadd.f32 %v727_v54, %v4536_v5  ;;  %v835_v53 = vld [vmem:[%s5514_s3 + $0x50] sm:$0xff] (%p479_p1) }
 0x142   : >> { %v766_v57 = vmax.f32 %v688_v51, 0.0  ;;  %v767_v58 = vmax.f32 %v702_v52, 0.0  ;;  %v775_v59 = vpack.c.bf16 %v702_v52, %v688_v51 }
 0x143   : >> { %v762_v60 = vmax.f32 %v714_v55, 0.0  ;;  %v763_v61 = vmax.f32 %v728_v56, 0.0  ;;  %v773_v63 = vpack.c.bf16 %v728_v56, %v714_v55  ;;  %v833_v55 = vld [vmem:[%s5514_s3 + $0x40] sm:$0xff] (%p479_p1)  ;;  %v836_v56 = vld [vmem:[%s5514_s3 + $0x58] sm:$0xff] (%p479_p1) }
 0x144   : >> { %812 = vst [vmem:[%s4625_s29 + $0x30] sm:$0xff] %v766_v57  ;;  %v792_v62 = vpack.c.bf16 %v767_v58, %v766_v57  ;;  %v834_v57 = vld [vmem:[%s5514_s3 + $0x48] sm:$0xff] (%p479_p1) }
 0x145   : >> { %786 = vst [vmem:[%s4620_s28 + $0x18] sm:$0xff] %v775_v59  ;;  %v790_v0 = vpack.c.bf16 %v763_v61, %v762_v60 }
 0x146   : >> { %800 = vst [vmem:[%s4623_s23 + $0x18] sm:$0xff] %v792_v62 }
 0x147   : >> { %813 = vst [vmem:[%s4625_s29 + $0x38] sm:$0xff] %v767_v58 }
 0x148   : >> { %807 = vst [vmem:[%s4625_s29 + $0x10] sm:$0xff] %v762_v60  ;;  %v715_v1 = vpop.f32.mrf.mxu2  ;;  %v729_v2 = vpop.f32.mrf.mxu3 }
 0x149   : >> { %782 = vst [vmem:[%s4620_s28 + $0x8] sm:$0xff] %v773_v63  ;;  %v716_v7 = vadd.f32 %v715_v1, %v4538_v6  ;;  %v730_v8 = vadd.f32 %v729_v2, %v4538_v6  ;;  %v827_v1 = vld [vmem:[%s5514_s3 + $0x10] sm:$0xff] (%p479_p1)  ;;  %v830_v2 = vld [vmem:[%s5514_s3 + $0x28] sm:$0xff] (%p479_p1) }
 0x14a   : >> { %798 = vst [vmem:[%s4623_s23 + $0x8] sm:$0xff] %v790_v0  ;;  %v829_v0 = vld [vmem:[%s5514_s3 + $0x20] sm:$0xff] (%p479_p1) }
 0x14b   : >> { %v741_v9 = vpop.f32.mrf.mxu0  ;;  %v755_v10 = vpop.f32.mrf.mxu1  ;;  %808 = vst [vmem:[%s4625_s29 + $0x18] sm:$0xff] %v763_v61  ;;  %v768_v13 = vmax.f32 %v716_v7, 0.0  ;;  %v769_v14 = vmax.f32 %v730_v8, 0.0  ;;  %v776_v15 = vpack.c.bf16 %v730_v8, %v716_v7  ;;  %v828_v7 = vld [vmem:[%s5514_s3 + $0x18] sm:$0xff] (%p479_p1) }
 0x14c   : >> { %v742_v11 = vadd.f32 %v741_v9, %v4536_v5  ;;  %v756_v12 = vadd.f32 %v755_v10, %v4536_v5  ;;  %v3911_v5 = vld [vmem:[%s5514_s3 + $0x78] sm:$0xff] (%p479_p1) }
 0x14d   : >> { %814 = vst [vmem:[%s4625_s29 + $0x40] sm:$0xff] %v768_v13  ;;  %v793_v18 = vpack.c.bf16 %v769_v14, %v768_v13  ;;  %958 = vmatpush.xpose.msra.mxu3 (%p479_p1), %v3911_v5  ;;  %v3934_v13 = vld [vmem:[%s5514_s3 + $0x100] sm:$0xff] (%p479_p1) }
 0x14e   : >> { %v764_v16 = vmax.f32 %v742_v11, 0.0  ;;  %v765_v17 = vmax.f32 %v756_v12, 0.0  ;;  %787 = vst [vmem:[%s4620_s28 + $0x20] sm:$0xff] %v776_v15  ;;  %v774_v19 = vpack.c.bf16 %v756_v12, %v742_v11  ;;  %v3932_v12 = vld [vmem:[%s5514_s3 + $0xf0] sm:$0xff] (%p479_p1)  ;;  %v3935_v15 = vld [vmem:[%s5514_s3 + $0x108] sm:$0xff] (%p479_p1) }
 0x14f   : >> { %801 = vst [vmem:[%s4623_s23 + $0x20] sm:$0xff] %v793_v18 }
 0x150   : >> { %v791_v21 = vpack.c.bf16 %v765_v17, %v764_v16  ;;  %815 = vst [vmem:[%s4625_s29 + $0x48] sm:$0xff] %v769_v14 }
 0x151   : >> { %809 = vst [vmem:[%s4625_s29 + $0x20] sm:$0xff] %v764_v16  ;;  %1061 = vmatpush.xpose.msrb.mxu3 (%p479_p1), %v832_v42  ;;  %v3933_v16 = vld [vmem:[%s5514_s3 + $0xf8] sm:$0xff] (%p479_p1) }
 0x152   : >> { %785 = vst.msk [vmem:[%s4620_s28 + $0x10] sm:$0xff] %vm4651_vm3, %v774_v19 }
 0x153   : >> { %v743_v22 = vpop.f32.mrf.mxu0  ;;  %v757_v23 = vpop.f32.mrf.mxu1  ;;  %799 = vst.msk [vmem:[%s4623_s23 + $0x10] sm:$0xff] %vm4651_vm3, %v791_v21 }
 0x154   : >> { %v744_v24 = vadd.f32 %v743_v22, %v4538_v6  ;;  %v758_v25 = vadd.f32 %v757_v23, %v4538_v6  ;;  %811 = vst.msk [vmem:[%s4625_s29 + $0x28] sm:$0xff] %vm810_vm4, %v765_v17  ;;  %v3909_v6 = vld [vmem:[%s5514_s3 + $0x68] sm:$0xff] (%p479_p1)  ;;  %v3926_v17 = vld [vmem:[%s5514_s3 + $0xc0] sm:$0xff] (%p479_p1) }
 0x155   : > { %918 = vmatpush.xpose.msra.mxu1 (%p479_p1), %v3909_v6  ;;  %1062 = vmatpush.xpose.msrb.mxu3 (%p479_p1), %v826_v46  ;;  %v3941_v6 = vld [vmem:[%s5514_s3 + $0x120] sm:$0xff] (%p479_p1)  ;;  %v3952_v46 = vld [vmem:[%s5514_s3 + $0x178] sm:$0xff] (%p479_p1) }
 0x156   : >> { %v770_v26 = vmax.f32 %v744_v24, 0.0  ;;  %v771_v27 = vmax.f32 %v758_v25, 0.0  ;;  %v777_v28 = vpack.c.bf16 %v758_v25, %v744_v24  ;;  %v3928_v25 = vld [vmem:[%s5514_s3 + $0xd0] sm:$0xff] (%p479_p1) }
 0x157   : > { %481 = sbr.rel (!%p479_p1) target bundleno = 158 (0x9e), region = 192 }
 0x158   : >> { %816 = vst [vmem:[%s4625_s29 + $0x50] sm:$0xff] %v770_v26  ;;  %v794_v29 = vpack.c.bf16 %v771_v27, %v770_v26  ;;  %v3929_v26 = vld [vmem:[%s5514_s3 + $0xd8] sm:$0xff] (%p479_p1) }
 0x159   : >> { %788 = vst.msk [vmem:[%s4620_s28 + $0x28] sm:$0xff] %vm4651_vm3, %v777_v28  ;;  %3920 = vmatpush.xpose.msk.msrb.mxu1 (%p479_p1), %vm810_vm4, %v3919_v43  ;;  %v3936_v28 = vld [vmem:[%s5514_s3 + $0x110] sm:$0xff] (%p479_p1)  ;;  %v3931_v43 = vld [vmem:[%s5514_s3 + $0xe8] sm:$0xff] (%p479_p1) }
 0x15a   : >> { %802 = vst.msk [vmem:[%s4623_s23 + $0x28] sm:$0xff] %vm4651_vm3, %v794_v29 }
 0x15b   : >> { %817 = vst.msk [vmem:[%s4625_s29 + $0x58] sm:$0xff] %vm810_vm4, %v771_v27  ;;  %v3927_v27 = vld [vmem:[%s5514_s3 + $0xc8] sm:$0xff] (%p479_p1)  ;;  %s5557_s29 = sld [smem:[#allocation19_spill]] (%p479_p1) }
 0x15d   : > { %3921 = vmatpush.xpose.msk.msrb.mxu1 %vm810_vm4, %v3913_v47  ;;  %v3950_v47 = vld [vmem:[%s5514_s3 + $0x168] sm:$0xff] }
 0x161   : > { %s3562_s30 = scalar_lea.hbm %s5557_s29, %s4140_s22  ;;  %s4279_s2 = scalar_lea.hbm %s5557_s29, 16 }
 0x162   : > { %v838_v34 = vld [vmem:[#allocation2 + $0x1] ss:$8 sm:$0xf]  ;;  %v818_v48 = vld [vmem:[#allocation2] ss:$8 sm:$0xf] }
 0x163   : > { %v839_v35 = vld [vmem:[#allocation2 + $0x1] ss:$8 sm:$0x30]  ;;  %v819_v49 = vld [vmem:[#allocation2] ss:$8 sm:$0x30] }
 0x164   : > { %v842_v36 = vld [vmem:[#allocation2 + $0x61] ss:$8 sm:$0xf]  ;;  %v840_v37 = vor.u32 %v839_v35, %v838_v34  ;;  %v822_v50 = vld [vmem:[#allocation2 + $0x60] ss:$8 sm:$0xf]  ;;  %v820_v52 = vor.u32 %v819_v49, %v818_v48 }
 0x165   : > { %v843_v38 = vld [vmem:[#allocation2 + $0x61] ss:$8 sm:$0x30]  ;;  %v823_v51 = vld [vmem:[#allocation2 + $0x60] ss:$8 sm:$0x30] }
 0x166   : > { %v844_v41 = vor.u32 %v843_v38, %v842_v36  ;;  %860 = vst [vmem:[#allocation1] ss:$9 sm:$0xff] %v840_v37  ;;  %v824_v54 = vor.u32 %v823_v51, %v822_v50  ;;  %v1148_v8 = vld [vmem:[#allocation2 + $0x2] ss:$8 sm:$0xf]  ;;  %s3566_s15 = sshll.u32 %s3562_s30, 4  ;;  %s3567_s15 = int_to_ptr.hbm [resolvable:$true] %s3566_s15 }
 0x167   : > { %v1149_v9 = vld [vmem:[#allocation2 + $0x2] ss:$8 sm:$0x30]  ;;  %v1314_v29 = vld [vmem:[#allocation2 + $0x3] ss:$8 sm:$0xf] }
 0x168   : > { %862 = vst [vmem:[#allocation1 + $0x1] ss:$9 sm:$0xff] %v844_v41  ;;  %v1152_v10 = vld [vmem:[#allocation2 + $0x62] ss:$8 sm:$0xf]  ;;  %v1150_v14 = vor.u32 %v1149_v9, %v1148_v8  ;;  %s4273_s13 = sshra.s32 %s3567_s15, 4  ;;  %s4274_s13 = int_to_ptr.hbm [resolvable:$true] %s4273_s13 }
 0x169   : > { %v1153_v11 = vld [vmem:[#allocation2 + $0x62] ss:$8 sm:$0x30]  ;;  %v1315_v30 = vld [vmem:[#allocation2 + $0x3] ss:$8 sm:$0x30]  ;;  %p4280_p6 = scmp.lt.s32.totalorder %s4274_s13, %s5557_s29 }
 0x16a   : > { %v1154_v18 = vor.u32 %v1153_v11, %v1152_v10  ;;  %v1318_v31 = vld [vmem:[#allocation2 + $0x63] ss:$8 sm:$0xf]  ;;  %v1316_v5 = vor.u32 %v1315_v30, %v1314_v29  ;;  %v1480_v48 = vld [vmem:[#allocation2 + $0x4] ss:$8 sm:$0xf] }
 0x16b   : > { %v1319_v32 = vld [vmem:[#allocation2 + $0x63] ss:$8 sm:$0x30]  ;;  %v3930_v34 = vld [vmem:[%s5514_s3 + $0xe0] sm:$0xff]  ;;  %s4275_s18 = scalar_lea.hbm %s4274_s13, 2 }
 0x16c   : > { %v3942_v35 = vld [vmem:[%s5514_s3 + $0x128] sm:$0xff]  ;;  %v1320_v36 = vor.u32 %v1319_v32, %v1318_v31  ;;  %v3956_v8 = vld [vmem:[%s5514_s3 + $0x180] sm:$0xff]  ;;  %p4276_p2 = scmp.ne.s32.totalorder %s4274_s13, %s4275_s18  ;;  %p4281_p7 = scmp.lt.s32.totalorder %s4279_s2, %s4275_s18 }
 0x16d   : > { %v1481_v49 = vld [vmem:[#allocation2 + $0x4] ss:$8 sm:$0x30]  ;;  %v1646_v9 = vld [vmem:[#allocation2 + $0x5] ss:$8 sm:$0xf] }
 0x16e   : > { %v1484_v50 = vld [vmem:[#allocation2 + $0x64] ss:$8 sm:$0xf]  ;;  %v1647_v10 = vld [vmem:[#allocation2 + $0x5] ss:$8 sm:$0x30]  ;;  %p4277_p4 = pnand %p4276_p2, %p4470_p3  ;;  %p4282_p9 = por %p4281_p7, %p4280_p6 }
 0x16f   : > { %v863_v58 = vld [vmem:[#allocation1] sm:$0xff]  ;;  %v868_v59 = vld [vmem:[#allocation1 + $0x2d] sm:$0xff] }
 0x170   : > { %v865_v60 = vld [vmem:[#allocation1 + $0x12] sm:$0xff]  ;;  %899 = vmatmul.f32.vlgmr.msra.gmra.mxu0 %v863_v58  ;;  %v866_v61 = vld [vmem:[#allocation1 + $0x1b] sm:$0xff]  ;;  %v864_v62 = vld [vmem:[#allocation1 + $0x9] sm:$0xff]  ;;  %p4278_p5 = pneg %p4277_p4 }
 0x171   : > { %939 = vmatmul.f32.vlgmr.msra.gmra.mxu2 %v865_v60  ;;  %v867_v63 = vld [vmem:[#allocation1 + $0x24] sm:$0xff]  ;;  %959 = vmatmul.f32.vlgmr.msra.gmra.mxu3 %v866_v61  ;;  %v1485_v51 = vld [vmem:[#allocation2 + $0x64] ss:$8 sm:$0x30] }
 0x172   : > { %919 = vmatmul.f32.vlgmr.msra.gmra.mxu1 %v864_v62  ;;  %1005 = vst [vmem:[#allocation1] ss:$9 sm:$0xff] %v820_v52  ;;  %1121 = vmatpush.xpose.msra.mxu2 %v835_v53  ;;  %v3943_v52 = vld [vmem:[%s5514_s3 + $0x130] sm:$0xff]  ;;  %v3945_v53 = vld [vmem:[%s5514_s3 + $0x140] sm:$0xff]  ;;  %v1486_v58 = vor.u32 %v1485_v51, %v1484_v50  ;;  %v3972_v30 = vld [vmem:[%s5514_s3 + $0x1e8] sm:$0xff]  ;;  %p4283_p10 = pnand %p4282_p9, %p4278_p5 }
 0x173   : > { %1007 = vst [vmem:[#allocation1 + $0x1] ss:$9 sm:$0xff] %v824_v54  ;;  %1081 = vmatpush.xpose.msra.mxu0 %v833_v55  ;;  %3923 = vmatpush.xpose.msk.msra.mxu3 %vm810_vm4, %v836_v56  ;;  %v1482_v54 = vor.u32 %v1481_v49, %v1480_v48  ;;  %v3946_v55 = vld [vmem:[%s5514_s3 + $0x148] sm:$0xff]  ;;  %v3944_v56 = vld [vmem:[%s5514_s3 + $0x138] sm:$0xff]  ;;  %v3971_v29 = vld [vmem:[%s5514_s3 + $0x1e0] sm:$0xff] }
 0x174   : > { %1101 = vmatpush.xpose.msra.mxu1 %v834_v57  ;;  %v3962_v57 = vld [vmem:[%s5514_s3 + $0x1b0] sm:$0xff]  ;;  %v3961_v31 = vld [vmem:[%s5514_s3 + $0x1a8] sm:$0xff] }
 0x175   : > { %v1650_v11 = vld [vmem:[#allocation2 + $0x65] ss:$8 sm:$0xf]  ;;  %v1812_v32 = vld [vmem:[#allocation2 + $0x6] ss:$8 sm:$0xf] }
 0x176   : > { %1122 = vmatpush.xpose.msra.mxu2 %v829_v0  ;;  %v3992_v48 = vld [vmem:[%s5514_s3 + $0x270] sm:$0xff] }
 0x177   : > { %1082 = vmatpush.xpose.msra.mxu0 %v827_v1  ;;  %3924 = vmatpush.xpose.msk.msra.mxu3 %vm810_vm4, %v830_v2  ;;  %v3964_v1 = vld [vmem:[%s5514_s3 + $0x1c0] sm:$0xff]  ;;  %v3965_v2 = vld [vmem:[%s5514_s3 + $0x1c8] sm:$0xff] }
 0x178   : > { %1102 = vmatpush.xpose.msra.mxu1 %v828_v7  ;;  %979 = vmatmul.f32.vlgmr.msrb.gmra.mxu0 %v867_v63  ;;  %v3963_v7 = vld [vmem:[%s5514_s3 + $0x1b8] sm:$0xff]  ;;  %v1979_v50 = vld [vmem:[#allocation2 + $0x7] ss:$8 sm:$0x30] }
 0x179   : > { %v1978_v49 = vld [vmem:[#allocation2 + $0x7] ss:$8 sm:$0xf] }
 0x17a   : > { %v1008_v19 = vld [vmem:[#allocation1] sm:$0xff]  ;;  %v1009_v20 = vld [vmem:[#allocation1 + $0x9] sm:$0xff]  ;;  %3922 = vmatmul.msk.f32.vlgmr.msrb.gmra.mxu1 %vm810_vm4, %v868_v59  ;;  %v1010_v21 = vld [vmem:[#allocation1 + $0x12] sm:$0xff] }
 0x17b   : > { %1206 = vmatpush.xpose.msrb.mxu0 %v3932_v12  ;;  %1043 = vmatmul.f32.vlgmr.msrb.gmra.mxu2 %v1008_v19  ;;  %v1012_v22 = vld [vmem:[#allocation1 + $0x24] sm:$0xff]  ;;  %v1013_v23 = vld [vmem:[#allocation1 + $0x2d] sm:$0xff]  ;;  %v1011_v24 = vld [vmem:[#allocation1 + $0x1b] sm:$0xff] }
 0x17c   : > { %1063 = vmatmul.f32.vlgmr.msrb.gmra.mxu3 %v1009_v20  ;;  %1246 = vmatpush.xpose.msrb.mxu2 %v3934_v13  ;;  %1170 = vst [vmem:[#allocation1] ss:$9 sm:$0xff] %v1150_v14  ;;  %v1651_v12 = vld [vmem:[#allocation2 + $0x65] ss:$8 sm:$0x30]  ;;  %v3959_v14 = vld [vmem:[%s5514_s3 + $0x198] sm:$0xff] }
 0x17d   : > { %1266 = vmatpush.xpose.msrb.mxu3 %v3935_v15  ;;  %1226 = vmatpush.xpose.msrb.mxu1 %v3933_v16  ;;  %1172 = vst [vmem:[#allocation1 + $0x1] ss:$9 sm:$0xff] %v1154_v18  ;;  %v3958_v13 = vld [vmem:[%s5514_s3 + $0x190] sm:$0xff]  ;;  %v3957_v15 = vld [vmem:[%s5514_s3 + $0x188] sm:$0xff]  ;;  %v1648_v16 = vor.u32 %v1647_v10, %v1646_v9  ;;  %v3978_v19 = vld [vmem:[%s5514_s3 + $0x218] sm:$0xff]  ;;  %v1652_v20 = vor.u32 %v1651_v12, %v1650_v11 }
 0x17e   : > { %v3966_v18 = vld [vmem:[%s5514_s3 + $0x1d0] sm:$0xff]  ;;  %v4008_v10 = vld [vmem:[%s5514_s3 + $0x2d8] sm:$0xff] }
 0x17f   : > { %1207 = vmatpush.xpose.msrb.mxu0 %v3926_v17  ;;  %v3977_v17 = vld [vmem:[%s5514_s3 + $0x210] sm:$0xff]  ;;  %v3997_v11 = vld [vmem:[%s5514_s3 + $0x298] sm:$0xff] }
 0x180   : > { %1247 = vmatpush.xpose.msrb.mxu2 %v3928_v25  ;;  %1083 = vmatmul.f32.vlgmr.msra.gmra.mxu0 %v1010_v21  ;;  %v1982_v51 = vld [vmem:[#allocation2 + $0x67] ss:$8 sm:$0xf]  ;;  %v2144_v12 = vld [vmem:[#allocation2 + $0x30] ss:$8 sm:$0xf] }
 0x181   : > { %1267 = vmatpush.xpose.msrb.mxu3 %v3929_v26  ;;  %1227 = vmatpush.xpose.msrb.mxu1 %v3927_v27  ;;  %v3967_v27 = vld [vmem:[%s5514_s3 + $0x1d8] sm:$0xff]  ;;  %v4007_v9 = vld [vmem:[%s5514_s3 + $0x2d0] sm:$0xff] }
 0x182   : > { %1103 = vmatmul.f32.vlgmr.msra.gmra.mxu1 %v1011_v24 }
 0x183   : > { %1286 = vmatpush.xpose.msra.mxu0 %v3936_v28  ;;  %1123 = vmatmul.f32.vlgmr.msra.gmra.mxu2 %v1012_v22  ;;  %v3960_v28 = vld [vmem:[%s5514_s3 + $0x1a0] sm:$0xff] }
 0x184   : > { %3925 = vmatmul.msk.f32.vlgmr.msra.gmra.mxu3 %vm810_vm4, %v1013_v23  ;;  %v1173_v37 = vld [vmem:[#allocation1] sm:$0xff]  ;;  %v1178_v38 = vld [vmem:[#allocation1 + $0x2d] sm:$0xff]  ;;  %1372 = vmatpush.xpose.msra.mxu2 %v3947_v33 }
 0x185   : > { %v1175_v39 = vld [vmem:[#allocation1 + $0x12] sm:$0xff]  ;;  %1392 = vmatpush.xpose.msra.mxu3 %v3948_v3  ;;  %v1176_v40 = vld [vmem:[#allocation1 + $0x1b] sm:$0xff]  ;;  %v1174_v41 = vld [vmem:[#allocation1 + $0x9] sm:$0xff]  ;;  %3938 = vmatpush.xpose.msk.msra.mxu1 %vm810_vm4, %v3937_v4 }
 0x186   : > { %v1177_v42 = vld [vmem:[#allocation1 + $0x24] sm:$0xff]  ;;  %v1813_v33 = vld [vmem:[#allocation2 + $0x6] ss:$8 sm:$0x30] }
 0x187   : > { %1287 = vmatpush.xpose.msra.mxu0 %v3930_v34  ;;  %1336 = vst [vmem:[#allocation1] ss:$9 sm:$0xff] %v1316_v5  ;;  %v1816_v3 = vld [vmem:[#allocation2 + $0x66] ss:$8 sm:$0xf]  ;;  %v1814_v34 = vor.u32 %v1813_v33, %v1812_v32 }
 0x188   : > { %1338 = vst [vmem:[#allocation1 + $0x1] ss:$9 sm:$0xff] %v1320_v36  ;;  %1373 = vmatpush.xpose.msra.mxu2 %v3941_v6  ;;  %1208 = vmatmul.f32.vlgmr.msrb.gmra.mxu0 %v1173_v37  ;;  %v1817_v4 = vld [vmem:[#allocation2 + $0x66] ss:$8 sm:$0x30]  ;;  %v3979_v5 = vld [vmem:[%s5514_s3 + $0x220] sm:$0xff] }
 0x189   : > { %1393 = vmatpush.xpose.msra.mxu3 %v3942_v35  ;;  %3939 = vmatpush.xpose.msk.msra.mxu1 %vm810_vm4, %v3931_v43  ;;  %v3981_v6 = vld [vmem:[%s5514_s3 + $0x230] sm:$0xff]  ;;  %v3982_v35 = vld [vmem:[%s5514_s3 + $0x238] sm:$0xff]  ;;  %v3980_v36 = vld [vmem:[%s5514_s3 + $0x228] sm:$0xff] }
 0x18a   : > { %1228 = vmatmul.f32.vlgmr.msrb.gmra.mxu1 %v1174_v41  ;;  %v3973_v37 = vld [vmem:[%s5514_s3 + $0x1f0] sm:$0xff] }
 0x18b   : > { %1412 = vmatpush.xpose.msrb.mxu0 %v3949_v44  ;;  %1248 = vmatmul.f32.vlgmr.msrb.gmra.mxu2 %v1175_v39  ;;  %v4003_v32 = vld [vmem:[%s5514_s3 + $0x2b0] sm:$0xff] }
 0x18c   : > { %1268 = vmatmul.f32.vlgmr.msrb.gmra.mxu3 %v1176_v40  ;;  %1452 = vmatpush.xpose.msrb.mxu2 %v3951_v45  ;;  %v3975_v45 = vld [vmem:[%s5514_s3 + $0x200] sm:$0xff] }
 0x18d   : > { %3953 = vmatpush.xpose.msk.msrb.mxu3 %vm810_vm4, %v3952_v46  ;;  %1432 = vmatpush.xpose.msrb.mxu1 %v3950_v47  ;;  %v3976_v46 = vld [vmem:[%s5514_s3 + $0x208] sm:$0xff]  ;;  %v3974_v47 = vld [vmem:[%s5514_s3 + $0x1f8] sm:$0xff] }
 0x18e   : > { %v2310_v33 = vld [vmem:[#allocation2 + $0x31] ss:$8 sm:$0xf] }
 0x18f   : > { %v1339_v59 = vld [vmem:[#allocation1] sm:$0xff]  ;;  %v1340_v60 = vld [vmem:[#allocation1 + $0x9] sm:$0xff]  ;;  %1413 = vmatpush.xpose.msrb.mxu0 %v3943_v52  ;;  %v1341_v61 = vld [vmem:[#allocation1 + $0x12] sm:$0xff] }
 0x190   : > { %v1343_v62 = vld [vmem:[#allocation1 + $0x24] sm:$0xff]  ;;  %v1344_v63 = vld [vmem:[#allocation1 + $0x2d] sm:$0xff]  ;;  %v1342_v0 = vld [vmem:[#allocation1 + $0x1b] sm:$0xff]  ;;  %1453 = vmatpush.xpose.msrb.mxu2 %v3945_v53  ;;  %1288 = vmatmul.f32.vlgmr.msra.gmra.mxu0 %v1177_v42 }
 0x191   : > { %3954 = vmatpush.xpose.msk.msrb.mxu3 %vm810_vm4, %v3946_v55  ;;  %1502 = vst [vmem:[#allocation1] ss:$9 sm:$0xff] %v1482_v54  ;;  %1433 = vmatpush.xpose.msrb.mxu1 %v3944_v56  ;;  %v1983_v52 = vld [vmem:[#allocation2 + $0x67] ss:$8 sm:$0x30]  ;;  %v3994_v53 = vld [vmem:[%s5514_s3 + $0x280] sm:$0xff]  ;;  %v1980_v56 = vor.u32 %v1979_v50, %v1978_v49 }
 0x192   : > { %1504 = vst [vmem:[#allocation1 + $0x1] ss:$9 sm:$0xff] %v1486_v58  ;;  %3940 = vmatmul.msk.f32.vlgmr.msra.gmra.mxu1 %vm810_vm4, %v1178_v38  ;;  %v1818_v38 = vor.u32 %v1817_v4, %v1816_v3  ;;  %v3995_v54 = vld [vmem:[%s5514_s3 + $0x288] sm:$0xff]  ;;  %v3993_v55 = vld [vmem:[%s5514_s3 + $0x278] sm:$0xff]  ;;  %v3986_v58 = vld [vmem:[%s5514_s3 + $0x240] sm:$0xff] }
 0x193   : > { %1538 = vmatpush.xpose.msra.mxu0 %v3962_v57  ;;  %1374 = vmatmul.f32.vlgmr.msra.gmra.mxu2 %v1339_v59  ;;  %v3988_v57 = vld [vmem:[%s5514_s3 + $0x250] sm:$0xff]  ;;  %v3989_v59 = vld [vmem:[%s5514_s3 + $0x258] sm:$0xff] }
 0x194   : > { %1394 = vmatmul.f32.vlgmr.msra.gmra.mxu3 %v1340_v60  ;;  %1578 = vmatpush.xpose.msra.mxu2 %v3964_v1  ;;  %v1984_v60 = vor.u32 %v1983_v52, %v1982_v51  ;;  %v2311_v3 = vld [vmem:[#allocation2 + $0x31] ss:$8 sm:$0x30]  ;;  %v4018_v49 = vld [vmem:[%s5514_s3 + $0x310] sm:$0xff]  ;;  %v4017_v51 = vld [vmem:[%s5514_s3 + $0x308] sm:$0xff] }
 0x195   : > { %1598 = vmatpush.xpose.msra.mxu3 %v3965_v2  ;;  %1558 = vmatpush.xpose.msra.mxu1 %v3963_v7  ;;  %v3987_v7 = vld [vmem:[%s5514_s3 + $0x248] sm:$0xff]  ;;  %v4019_v50 = vld [vmem:[%s5514_s3 + $0x318] sm:$0xff] }
 0x196   : > { %v2314_v4 = vld [vmem:[#allocation2 + $0x91] ss:$8 sm:$0xf]  ;;  %v2476_v52 = vld [vmem:[#allocation2 + $0x32] ss:$8 sm:$0xf] }
 0x197   : > { %1539 = vmatpush.xpose.msra.mxu0 %v3956_v8  ;;  %v3996_v8 = vld [vmem:[%s5514_s3 + $0x290] sm:$0xff] }
 0x198   : > { %1579 = vmatpush.xpose.msra.mxu2 %v3958_v13  ;;  %1414 = vmatmul.f32.vlgmr.msrb.gmra.mxu0 %v1341_v61  ;;  %v2145_v13 = vld [vmem:[#allocation2 + $0x30] ss:$8 sm:$0x30] }
 0x199   : > { %1599 = vmatpush.xpose.msra.mxu3 %v3959_v14  ;;  %v1505_v21 = vld [vmem:[#allocation1] sm:$0xff]  ;;  %v4867_v22 = vld [vmem:[#allocation1 + $0x2d] sm:$0xff]  ;;  %1559 = vmatpush.xpose.msra.mxu1 %v3957_v15 }
 0x19a   : > { %v1507_v23 = vld [vmem:[#allocation1 + $0x12] sm:$0xff]  ;;  %v1508_v24 = vld [vmem:[#allocation1 + $0x1b] sm:$0xff]  ;;  %v1506_v25 = vld [vmem:[#allocation1 + $0x9] sm:$0xff]  ;;  %1434 = vmatmul.f32.vlgmr.msrb.gmra.mxu1 %v1342_v0 }
 0x19b   : > { %v1509_v26 = vld [vmem:[#allocation1 + $0x24] sm:$0xff]  ;;  %1618 = vmatpush.xpose.msrb.mxu0 %v3966_v18  ;;  %1454 = vmatmul.f32.vlgmr.msrb.gmra.mxu2 %v1343_v62  ;;  %v2149_v15 = vld [vmem:[#allocation2 + $0x90] ss:$8 sm:$0x30]  ;;  %v2146_v18 = vor.u32 %v2145_v13, %v2144_v12 }
 0x19c   : > { %1668 = vst [vmem:[#allocation1] ss:$9 sm:$0xff] %v1648_v16  ;;  %3955 = vmatmul.msk.f32.vlgmr.msrb.gmra.mxu3 %vm810_vm4, %v1344_v63  ;;  %1704 = vmatpush.xpose.msrb.mxu2 %v3977_v17  ;;  %v2148_v14 = vld [vmem:[#allocation2 + $0x90] ss:$8 sm:$0xf] }
 0x19d   : > { %1670 = vst [vmem:[#allocation1 + $0x1] ss:$9 sm:$0xff] %v1652_v20  ;;  %1724 = vmatpush.xpose.msrb.mxu3 %v3978_v19  ;;  %3968 = vmatpush.xpose.msk.msrb.mxu1 %vm810_vm4, %v3967_v27  ;;  %v3990_v16 = vld [vmem:[%s5514_s3 + $0x260] sm:$0xff]  ;;  %v4002_v19 = vld [vmem:[%s5514_s3 + $0x2a8] sm:$0xff] }
 0x19e   : > { %v4001_v17 = vld [vmem:[%s5514_s3 + $0x2a0] sm:$0xff]  ;;  %v3991_v20 = vld [vmem:[%s5514_s3 + $0x268] sm:$0xff] }
 0x19f   : > { %1619 = vmatpush.xpose.msrb.mxu0 %v3960_v28  ;;  %v4039_v12 = vld [vmem:[%s5514_s3 + $0x3a0] sm:$0xff] }
 0x1a0   : > { %1705 = vmatpush.xpose.msrb.mxu2 %v3971_v29  ;;  %1540 = vmatmul.f32.vlgmr.msra.gmra.mxu0 %v1505_v21  ;;  %v4009_v21 = vld [vmem:[%s5514_s3 + $0x2e0] sm:$0xff]  ;;  %v4011_v29 = vld [vmem:[%s5514_s3 + $0x2f0] sm:$0xff] }
 0x1a1   : > { %1725 = vmatpush.xpose.msrb.mxu3 %v3972_v30  ;;  %3969 = vmatpush.xpose.msk.msrb.mxu1 %vm810_vm4, %v3961_v31  ;;  %v4012_v30 = vld [vmem:[%s5514_s3 + $0x2f8] sm:$0xff]  ;;  %v4010_v31 = vld [vmem:[%s5514_s3 + $0x2e8] sm:$0xff] }
 0x1a2   : > { %1560 = vmatmul.f32.vlgmr.msra.gmra.mxu1 %v1506_v25  ;;  %v2642_v13 = vld [vmem:[#allocation2 + $0x33] ss:$8 sm:$0xf] }
 0x1a3   : > { %1744 = vmatpush.xpose.msra.mxu0 %v3979_v5  ;;  %1580 = vmatmul.f32.vlgmr.msra.gmra.mxu2 %v1507_v23  ;;  %v2315_v5 = vld [vmem:[#allocation2 + $0x91] ss:$8 sm:$0x30] }
 0x1a4   : > { %v1671_v39 = vld [vmem:[#allocation1] sm:$0xff]  ;;  %v1672_v40 = vld [vmem:[#allocation1 + $0x9] sm:$0xff]  ;;  %v1673_v41 = vld [vmem:[#allocation1 + $0x12] sm:$0xff]  ;;  %1600 = vmatmul.f32.vlgmr.msra.gmra.mxu3 %v1508_v24  ;;  %1784 = vmatpush.xpose.msra.mxu2 %v3981_v6 }
 0x1a5   : > { %v1675_v42 = vld [vmem:[#allocation1 + $0x24] sm:$0xff]  ;;  %v1676_v43 = vld [vmem:[#allocation1 + $0x2d] sm:$0xff]  ;;  %v1674_v44 = vld [vmem:[#allocation1 + $0x1b] sm:$0xff]  ;;  %3983 = vmatpush.xpose.msk.msra.mxu3 %vm810_vm4, %v3982_v35  ;;  %1764 = vmatpush.xpose.msra.mxu1 %v3980_v36  ;;  %v2312_v36 = vor.u32 %v2311_v3, %v2310_v33 }
 0x1a6   : > { %1834 = vst [vmem:[#allocation1] ss:$9 sm:$0xff] %v1814_v34  ;;  %v4005_v6 = vld [vmem:[%s5514_s3 + $0x2c0] sm:$0xff]  ;;  %v4006_v34 = vld [vmem:[%s5514_s3 + $0x2c8] sm:$0xff]  ;;  %v4004_v35 = vld [vmem:[%s5514_s3 + $0x2b8] sm:$0xff] }
 0x1a7   : > { %1836 = vst [vmem:[#allocation1 + $0x1] ss:$9 sm:$0xff] %v1818_v38  ;;  %1745 = vmatpush.xpose.msra.mxu0 %v3973_v37  ;;  %v4024_v37 = vld [vmem:[%s5514_s3 + $0x340] sm:$0xff]  ;;  %v4022_v38 = vld [vmem:[%s5514_s3 + $0x330] sm:$0xff]  ;;  %v4055_v3 = vld [vmem:[%s5514_s3 + $0x408] sm:$0xff] }
 0x1a8   : > { %1785 = vmatpush.xpose.msra.mxu2 %v3975_v45  ;;  %1620 = vmatmul.f32.vlgmr.msrb.gmra.mxu0 %v1509_v26  ;;  %v4054_v33 = vld [vmem:[%s5514_s3 + $0x400] sm:$0xff] }
 0x1a9   : > { %3984 = vmatpush.xpose.msk.msra.mxu3 %vm810_vm4, %v3976_v46  ;;  %1765 = vmatpush.xpose.msra.mxu1 %v3974_v47  ;;  %v4023_v47 = vld [vmem:[%s5514_s3 + $0x338] sm:$0xff] }
 0x1aa   : > { %3970 = vmatmul.msk.f32.vlgmr.msrb.gmra.mxu1 %vm810_vm4, %v4867_v22  ;;  %v2150_v22 = vor.u32 %v2149_v15, %v2148_v14  ;;  %v2643_v14 = vld [vmem:[#allocation2 + $0x33] ss:$8 sm:$0x30] }
 0x1ab   : > { %1870 = vmatpush.xpose.msrb.mxu0 %v3992_v48  ;;  %1706 = vmatmul.f32.vlgmr.msrb.gmra.mxu2 %v1671_v39  ;;  %v4025_v39 = vld [vmem:[%s5514_s3 + $0x348] sm:$0xff]  ;;  %v4016_v48 = vld [vmem:[%s5514_s3 + $0x300] sm:$0xff] }
 0x1ac   : > { %1726 = vmatmul.f32.vlgmr.msrb.gmra.mxu3 %v1672_v40  ;;  %1910 = vmatpush.xpose.msrb.mxu2 %v3994_v53  ;;  %v2316_v40 = vor.u32 %v2315_v5, %v2314_v4  ;;  %v2477_v53 = vld [vmem:[#allocation2 + $0x32] ss:$8 sm:$0x30]  ;;  %v2646_v15 = vld [vmem:[#allocation2 + $0x93] ss:$8 sm:$0xf] }
 0x1ad   : > { %1930 = vmatpush.xpose.msrb.mxu3 %v3995_v54  ;;  %1890 = vmatpush.xpose.msrb.mxu1 %v3993_v55  ;;  %v2480_v54 = vld [vmem:[#allocation2 + $0x92] ss:$8 sm:$0xf]  ;;  %v2808_v5 = vld [vmem:[#allocation2 + $0x34] ss:$8 sm:$0xf] }
 0x1ae   : > { %v1837_v61 = vld [vmem:[#allocation1] sm:$0xff]  ;;  %v4936_v62 = vld [vmem:[#allocation1 + $0x2d] sm:$0xff]  ;;  %v4053_v4 = vld [vmem:[%s5514_s3 + $0x3f8] sm:$0xff] }
 0x1af   : > { %v1839_v63 = vld [vmem:[#allocation1 + $0x12] sm:$0xff]  ;;  %v1840_v0 = vld [vmem:[#allocation1 + $0x1b] sm:$0xff]  ;;  %v1838_v1 = vld [vmem:[#allocation1 + $0x9] sm:$0xff]  ;;  %1871 = vmatpush.xpose.msrb.mxu0 %v3986_v58  ;;  %v2478_v58 = vor.u32 %v2477_v53, %v2476_v52 }
 0x1b0   : > { %v4938_v2 = vld [vmem:[#allocation1 + $0x24] sm:$0xff]  ;;  %1911 = vmatpush.xpose.msrb.mxu2 %v3988_v57  ;;  %1746 = vmatmul.f32.vlgmr.msra.gmra.mxu0 %v1673_v41  ;;  %v2481_v55 = vld [vmem:[#allocation2 + $0x92] ss:$8 sm:$0x30]  ;;  %v4037_v57 = vld [vmem:[%s5514_s3 + $0x390] sm:$0xff] }
 0x1b1   : > { %2000 = vst [vmem:[#allocation1] ss:$9 sm:$0xff] %v1980_v56  ;;  %1931 = vmatpush.xpose.msrb.mxu3 %v3989_v59  ;;  %1891 = vmatpush.xpose.msrb.mxu1 %v3987_v7  ;;  %v4026_v56 = vld [vmem:[%s5514_s3 + $0x350] sm:$0xff]  ;;  %v4038_v59 = vld [vmem:[%s5514_s3 + $0x398] sm:$0xff]  ;;  %v4061_v52 = vld [vmem:[%s5514_s3 + $0x420] sm:$0xff] }
 0x1b2   : > { %2002 = vst [vmem:[#allocation1 + $0x1] ss:$9 sm:$0xff] %v1984_v60  ;;  %1766 = vmatmul.f32.vlgmr.msra.gmra.mxu1 %v1674_v44  ;;  %v4027_v60 = vld [vmem:[%s5514_s3 + $0x358] sm:$0xff]  ;;  %v4050_v53 = vld [vmem:[%s5514_s3 + $0x3e0] sm:$0xff] }
 0x1b3   : > { %1950 = vmatpush.xpose.msra.mxu0 %v3996_v8  ;;  %1786 = vmatmul.f32.vlgmr.msra.gmra.mxu2 %v1675_v42 }
 0x1b4   : > { %3985 = vmatmul.msk.f32.vlgmr.msra.gmra.mxu3 %vm810_vm4, %v1676_v43  ;;  %2036 = vmatpush.xpose.msra.mxu2 %v4007_v9  ;;  %v4031_v9 = vld [vmem:[%s5514_s3 + $0x360] sm:$0xff] }
 0x1b5   : > { %2056 = vmatpush.xpose.msra.mxu3 %v4008_v10  ;;  %3998 = vmatpush.xpose.msk.msra.mxu1 %vm810_vm4, %v3997_v11  ;;  %v4032_v10 = vld [vmem:[%s5514_s3 + $0x368] sm:$0xff] }
 0x1b6   : > { %v4021_v11 = vld [vmem:[%s5514_s3 + $0x328] sm:$0xff] }
 0x1b7   : > { %1951 = vmatpush.xpose.msra.mxu0 %v3990_v16  ;;  %v2647_v16 = vld [vmem:[#allocation2 + $0x93] ss:$8 sm:$0x30] }
 0x1b8   : > { %2037 = vmatpush.xpose.msra.mxu2 %v4001_v17  ;;  %1872 = vmatmul.f32.vlgmr.msrb.gmra.mxu0 %v1837_v61  ;;  %v4020_v61 = vld [vmem:[%s5514_s3 + $0x320] sm:$0xff]  ;;  %v4041_v17 = vld [vmem:[%s5514_s3 + $0x3b0] sm:$0xff] }
 0x1b9   : > { %v2003_v23 = vld [vmem:[#allocation1] sm:$0xff]  ;;  %v2004_v24 = vld [vmem:[#allocation1 + $0x9] sm:$0xff]  ;;  %v4972_v25 = vld [vmem:[#allocation1 + $0x12] sm:$0xff]  ;;  %2057 = vmatpush.xpose.msra.mxu3 %v4002_v19  ;;  %3999 = vmatpush.xpose.msk.msra.mxu1 %vm810_vm4, %v3991_v20  ;;  %v2644_v20 = vor.u32 %v2643_v14, %v2642_v13 }
 0x1ba   : > { %v4974_v26 = vld [vmem:[#allocation1 + $0x24] sm:$0xff]  ;;  %v4976_v27 = vld [vmem:[#allocation1 + $0x2d] sm:$0xff]  ;;  %v4978_v28 = vld [vmem:[#allocation1 + $0x1b] sm:$0xff]  ;;  %1892 = vmatmul.f32.vlgmr.msrb.gmra.mxu1 %v1838_v1 }
 0x1bb   : > { %2166 = vst [vmem:[#allocation1] ss:$9 sm:$0xff] %v2146_v18  ;;  %2076 = vmatpush.xpose.msrb.mxu0 %v4009_v21  ;;  %1912 = vmatmul.f32.vlgmr.msrb.gmra.mxu2 %v1839_v63  ;;  %v4042_v18 = vld [vmem:[%s5514_s3 + $0x3b8] sm:$0xff]  ;;  %v4040_v19 = vld [vmem:[%s5514_s3 + $0x3a8] sm:$0xff]  ;;  %v4035_v21 = vld [vmem:[%s5514_s3 + $0x380] sm:$0xff] }
 0x1bc   : > { %2168 = vst [vmem:[#allocation1 + $0x1] ss:$9 sm:$0xff] %v2150_v22  ;;  %1932 = vmatmul.f32.vlgmr.msrb.gmra.mxu3 %v1840_v0  ;;  %2116 = vmatpush.xpose.msrb.mxu2 %v4011_v29  ;;  %v4033_v22 = vld [vmem:[%s5514_s3 + $0x370] sm:$0xff]  ;;  %v4065_v13 = vld [vmem:[%s5514_s3 + $0x440] sm:$0xff]  ;;  %v4066_v14 = vld [vmem:[%s5514_s3 + $0x448] sm:$0xff] }
 0x1bd   : > { %4013 = vmatpush.xpose.msk.msrb.mxu3 %vm810_vm4, %v4012_v30  ;;  %2096 = vmatpush.xpose.msrb.mxu1 %v4010_v31  ;;  %v4034_v31 = vld [vmem:[%s5514_s3 + $0x378] sm:$0xff] }
 0x1bf   : > { %2077 = vmatpush.xpose.msrb.mxu0 %v4003_v32  ;;  %v4052_v32 = vld [vmem:[%s5514_s3 + $0x3f0] sm:$0xff] }
 0x1c0   : > { %2117 = vmatpush.xpose.msrb.mxu2 %v4005_v6  ;;  %1952 = vmatmul.f32.vlgmr.msra.gmra.mxu0 %v4938_v2  ;;  %v2809_v6 = vld [vmem:[#allocation2 + $0x34] ss:$8 sm:$0x30] }
 0x1c1   : > { %4014 = vmatpush.xpose.msk.msrb.mxu3 %vm810_vm4, %v4006_v34  ;;  %2097 = vmatpush.xpose.msrb.mxu1 %v4004_v35  ;;  %v2812_v34 = vld [vmem:[#allocation2 + $0x94] ss:$8 sm:$0xf] }
 0x1c2   : > { %4000 = vmatmul.msk.f32.vlgmr.msra.gmra.mxu1 %vm810_vm4, %v4936_v62  ;;  %v2482_v62 = vor.u32 %v2481_v55, %v2480_v54  ;;  %v2813_v35 = vld [vmem:[#allocation2 + $0x94] ss:$8 sm:$0x30]  ;;  %v4062_v54 = vld [vmem:[%s5514_s3 + $0x428] sm:$0xff] }
 0x1c3   : > { %v5013_v41 = vld [vmem:[#allocation1] sm:$0xff]  ;;  %v5015_v42 = vld [vmem:[#allocation1 + $0x2d] sm:$0xff]  ;;  %2202 = vmatpush.xpose.msra.mxu0 %v4022_v38  ;;  %2038 = vmatmul.f32.vlgmr.msra.gmra.mxu2 %v2003_v23  ;;  %v2810_v38 = vor.u32 %v2809_v6, %v2808_v5 }
 0x1c4   : > { %v5017_v43 = vld [vmem:[#allocation1 + $0x12] sm:$0xff]  ;;  %v5020_v44 = vld [vmem:[#allocation1 + $0x1b] sm:$0xff]  ;;  %v2170_v45 = vld [vmem:[#allocation1 + $0x9] sm:$0xff]  ;;  %2058 = vmatmul.f32.vlgmr.msra.gmra.mxu3 %v2004_v24  ;;  %2242 = vmatpush.xpose.msra.mxu2 %v4024_v37  ;;  %v2648_v24 = vor.u32 %v2647_v16, %v2646_v15 }
 0x1c5   : > { %v5022_v46 = vld [vmem:[#allocation1 + $0x24] sm:$0xff]  ;;  %2262 = vmatpush.xpose.msra.mxu3 %v4025_v39  ;;  %2222 = vmatpush.xpose.msra.mxu1 %v4023_v47  ;;  %v4048_v37 = vld [vmem:[%s5514_s3 + $0x3d0] sm:$0xff]  ;;  %v4049_v39 = vld [vmem:[%s5514_s3 + $0x3d8] sm:$0xff] }
 0x1c6   : > { %2332 = vst [vmem:[#allocation1] ss:$9 sm:$0xff] %v2312_v36  ;;  %v4036_v23 = vld [vmem:[%s5514_s3 + $0x388] sm:$0xff]  ;;  %v4046_v36 = vld [vmem:[%s5514_s3 + $0x3c0] sm:$0xff]  ;;  %v4064_v16 = vld [vmem:[%s5514_s3 + $0x438] sm:$0xff] }
 0x1c7   : > { %2334 = vst [vmem:[#allocation1 + $0x1] ss:$9 sm:$0xff] %v2316_v40  ;;  %2203 = vmatpush.xpose.msra.mxu0 %v4016_v48  ;;  %v4047_v40 = vld [vmem:[%s5514_s3 + $0x3c8] sm:$0xff] }
 0x1c8   : > { %2243 = vmatpush.xpose.msra.mxu2 %v4018_v49  ;;  %2078 = vmatmul.f32.vlgmr.msrb.gmra.mxu0 %v4972_v25  ;;  %v4067_v49 = vld [vmem:[%s5514_s3 + $0x450] sm:$0xff] }
 0x1c9   : > { %2263 = vmatpush.xpose.msra.mxu3 %v4019_v50  ;;  %2223 = vmatpush.xpose.msra.mxu1 %v4017_v51  ;;  %v4068_v50 = vld [vmem:[%s5514_s3 + $0x458] sm:$0xff] }
 0x1ca   : > { %2098 = vmatmul.f32.vlgmr.msrb.gmra.mxu1 %v4978_v28  ;;  %v4057_v51 = vld [vmem:[%s5514_s3 + $0x418] sm:$0xff] }
 0x1cb   : > { %2282 = vmatpush.xpose.msrb.mxu0 %v4026_v56  ;;  %2118 = vmatmul.f32.vlgmr.msrb.gmra.mxu2 %v4974_v26  ;;  %v2974_v55 = vld [vmem:[#allocation2 + $0x35] ss:$8 sm:$0xf] }
 0x1cc   : > { %4015 = vmatmul.msk.f32.vlgmr.msrb.gmra.mxu3 %vm810_vm4, %v4976_v27  ;;  %2368 = vmatpush.xpose.msrb.mxu2 %v4037_v57  ;;  %v2975_v56 = vld [vmem:[#allocation2 + $0x35] ss:$8 sm:$0x30] }
 0x1cd   : > { %2388 = vmatpush.xpose.msrb.mxu3 %v4038_v59  ;;  %4028 = vmatpush.xpose.msk.msrb.mxu1 %vm810_vm4, %v4027_v60  ;;  %v2978_v57 = vld [vmem:[#allocation2 + $0x95] ss:$8 sm:$0xf] }
 0x1ce   : > { %v5058_v63 = vld [vmem:[#allocation1] sm:$0xff]  ;;  %v5060_v0 = vld [vmem:[#allocation1 + $0x9] sm:$0xff]  ;;  %v5062_v1 = vld [vmem:[#allocation1 + $0x12] sm:$0xff] }
 0x1cf   : > { %v5067_v2 = vld [vmem:[#allocation1 + $0x24] sm:$0xff]  ;;  %v5069_v7 = vld [vmem:[#allocation1 + $0x2d] sm:$0xff]  ;;  %v5071_v8 = vld [vmem:[#allocation1 + $0x1b] sm:$0xff]  ;;  %2283 = vmatpush.xpose.msrb.mxu0 %v4020_v61 }
 0x1d0   : > { %2498 = vst [vmem:[#allocation1] ss:$9 sm:$0xff] %v2478_v58  ;;  %2369 = vmatpush.xpose.msrb.mxu2 %v4031_v9  ;;  %2204 = vmatmul.f32.vlgmr.msra.gmra.mxu0 %v5013_v41  ;;  %v4056_v41 = vld [vmem:[%s5514_s3 + $0x410] sm:$0xff]  ;;  %v2979_v58 = vld [vmem:[#allocation2 + $0x95] ss:$8 sm:$0x30] }
 0x1d1   : > { %2500 = vst [vmem:[#allocation1 + $0x1] ss:$9 sm:$0xff] %v2482_v62  ;;  %2389 = vmatpush.xpose.msrb.mxu3 %v4032_v10  ;;  %4029 = vmatpush.xpose.msk.msrb.mxu1 %vm810_vm4, %v4021_v11  ;;  %v4051_v59 = vld [vmem:[%s5514_s3 + $0x3e8] sm:$0xff]  ;;  %v4071_v60 = vld [vmem:[%s5514_s3 + $0x470] sm:$0xff]  ;;  %v4069_v61 = vld [vmem:[%s5514_s3 + $0x460] sm:$0xff]  ;;  %v2976_v62 = vor.u32 %v2975_v56, %v2974_v55 }
 0x1d2   : > { %2224 = vmatmul.f32.vlgmr.msra.gmra.mxu1 %v2170_v45  ;;  %v4070_v10 = vld [vmem:[%s5514_s3 + $0x468] sm:$0xff]  ;;  %v4091_v55 = vld [vmem:[%s5514_s3 + $0x4e0] sm:$0xff] }
 0x1d3   : > { %2408 = vmatpush.xpose.msra.mxu0 %v4039_v12  ;;  %2244 = vmatmul.f32.vlgmr.msra.gmra.mxu2 %v5017_v43  ;;  %v4063_v12 = vld [vmem:[%s5514_s3 + $0x430] sm:$0xff] }
 0x1d4   : > { %2264 = vmatmul.f32.vlgmr.msra.gmra.mxu3 %v5020_v44  ;;  %2448 = vmatpush.xpose.msra.mxu2 %v4041_v17 }
 0x1d5   : > { %4043 = vmatpush.xpose.msk.msra.mxu3 %vm810_vm4, %v4042_v18  ;;  %2428 = vmatpush.xpose.msra.mxu1 %v4040_v19  ;;  %v4082_v18 = vld [vmem:[%s5514_s3 + $0x4b0] sm:$0xff] }
 0x1d6   : > { %v3140_v19 = vld [vmem:[#allocation2 + $0x36] ss:$8 sm:$0xf] }
 0x1d7   : > { %2409 = vmatpush.xpose.msra.mxu0 %v4033_v22  ;;  %v4085_v22 = vld [vmem:[%s5514_s3 + $0x4c8] sm:$0xff] }
 0x1d8   : > { %v5109_v25 = vld [vmem:[#allocation1] sm:$0xff]  ;;  %v5111_v26 = vld [vmem:[#allocation1 + $0x2d] sm:$0xff]  ;;  %2449 = vmatpush.xpose.msra.mxu2 %v4035_v21  ;;  %2284 = vmatmul.f32.vlgmr.msrb.gmra.mxu0 %v5022_v46 }
 0x1d9   : > { %v5113_v27 = vld [vmem:[#allocation1 + $0x12] sm:$0xff]  ;;  %v5115_v28 = vld [vmem:[#allocation1 + $0x1b] sm:$0xff]  ;;  %v5117_v29 = vld [vmem:[#allocation1 + $0x9] sm:$0xff]  ;;  %4044 = vmatpush.xpose.msk.msra.mxu3 %vm810_vm4, %v4036_v23  ;;  %2429 = vmatpush.xpose.msra.mxu1 %v4034_v31 }
 0x1da   : > { %v5119_v30 = vld [vmem:[#allocation1 + $0x24] sm:$0xff]  ;;  %4030 = vmatmul.msk.f32.vlgmr.msrb.gmra.mxu1 %vm810_vm4, %v5015_v42  ;;  %v2814_v42 = vor.u32 %v2813_v35, %v2812_v34 }
 0x1db   : > { %2664 = vst [vmem:[#allocation1] ss:$9 sm:$0xff] %v2644_v20  ;;  %2534 = vmatpush.xpose.msrb.mxu0 %v4052_v32  ;;  %2370 = vmatmul.f32.vlgmr.msrb.gmra.mxu2 %v5058_v63  ;;  %v3141_v20 = vld [vmem:[#allocation2 + $0x36] ss:$8 sm:$0x30] }
 0x1dc   : > { %2666 = vst [vmem:[#allocation1 + $0x1] ss:$9 sm:$0xff] %v2648_v24  ;;  %2390 = vmatmul.f32.vlgmr.msrb.gmra.mxu3 %v5060_v0  ;;  %2574 = vmatpush.xpose.msrb.mxu2 %v4054_v33  ;;  %v4084_v21 = vld [vmem:[%s5514_s3 + $0x4c0] sm:$0xff]  ;;  %v4083_v24 = vld [vmem:[%s5514_s3 + $0x4b8] sm:$0xff] }
 0x1dd   : > { %2594 = vmatpush.xpose.msrb.mxu3 %v4055_v3  ;;  %2554 = vmatpush.xpose.msrb.mxu1 %v4053_v4  ;;  %v3144_v23 = vld [vmem:[#allocation2 + $0x96] ss:$8 sm:$0xf] }
 0x1de   : > { %v4079_v33 = vld [vmem:[%s5514_s3 + $0x498] sm:$0xff] }
 0x1df   : > { %2535 = vmatpush.xpose.msrb.mxu0 %v4046_v36 }
 0x1e0   : > { %2575 = vmatpush.xpose.msrb.mxu2 %v4048_v37  ;;  %2410 = vmatmul.f32.vlgmr.msra.gmra.mxu0 %v5062_v1 }
 0x1e1   : > { %2595 = vmatpush.xpose.msrb.mxu3 %v4049_v39  ;;  %2555 = vmatpush.xpose.msrb.mxu1 %v4047_v40 }
 0x1e2   : > { %2430 = vmatmul.f32.vlgmr.msra.gmra.mxu1 %v5071_v8 }
 0x1e3   : > { %v5157_v43 = vld [vmem:[#allocation1] sm:$0xff]  ;;  %v5159_v44 = vld [vmem:[#allocation1 + $0x9] sm:$0xff]  ;;  %v5161_v45 = vld [vmem:[#allocation1 + $0x12] sm:$0xff]  ;;  %2614 = vmatpush.xpose.msra.mxu0 %v4056_v41  ;;  %2450 = vmatmul.f32.vlgmr.msra.gmra.mxu2 %v5067_v2  ;;  %v2980_v2 = vor.u32 %v2979_v58, %v2978_v57 }
 0x1e4   : > { %v5163_v46 = vld [vmem:[#allocation1 + $0x24] sm:$0xff]  ;;  %v5165_v47 = vld [vmem:[#allocation1 + $0x2d] sm:$0xff]  ;;  %v5167_v48 = vld [vmem:[#allocation1 + $0x1b] sm:$0xff]  ;;  %4045 = vmatmul.msk.f32.vlgmr.msra.gmra.mxu3 %vm810_vm4, %v5069_v7  ;;  %2700 = vmatpush.xpose.msra.mxu2 %v4067_v49 }
 0x1e5   : > { %2830 = vst [vmem:[#allocation1] ss:$9 sm:$0xff] %v2810_v38  ;;  %2720 = vmatpush.xpose.msra.mxu3 %v4068_v50  ;;  %4058 = vmatpush.xpose.msk.msra.mxu1 %vm810_vm4, %v4057_v51  ;;  %v4072_v7 = vld [vmem:[%s5514_s3 + $0x478] sm:$0xff]  ;;  %v4077_v38 = vld [vmem:[%s5514_s3 + $0x488] sm:$0xff]  ;;  %v4086_v41 = vld [vmem:[%s5514_s3 + $0x4d0] sm:$0xff] }
 0x1e6   : > { %2832 = vst [vmem:[#allocation1 + $0x1] ss:$9 sm:$0xff] %v2814_v42  ;;  %v4097_v42 = vld [vmem:[%s5514_s3 + $0x510] sm:$0xff]  ;;  %v4087_v49 = vld [vmem:[%s5514_s3 + $0x4d8] sm:$0xff]  ;;  %v4080_v50 = vld [vmem:[%s5514_s3 + $0x4a0] sm:$0xff] }
 0x1e7   : > { %2615 = vmatpush.xpose.msra.mxu0 %v4050_v53  ;;  %v3306_v51 = vld [vmem:[#allocation2 + $0x37] ss:$8 sm:$0xf] }
 0x1e8   : > { %2701 = vmatpush.xpose.msra.mxu2 %v4061_v52  ;;  %2536 = vmatmul.f32.vlgmr.msrb.gmra.mxu0 %v5109_v25  ;;  %v3142_v25 = vor.u32 %v3141_v20, %v3140_v19  ;;  %v3307_v52 = vld [vmem:[#allocation2 + $0x37] ss:$8 sm:$0x30]  ;;  %v4093_v19 = vld [vmem:[%s5514_s3 + $0x4f0] sm:$0xff] }
 0x1e9   : > { %2721 = vmatpush.xpose.msra.mxu3 %v4062_v54  ;;  %4059 = vmatpush.xpose.msk.msra.mxu1 %vm810_vm4, %v4051_v59  ;;  %v3311_v54 = vld [vmem:[#allocation2 + $0x97] ss:$8 sm:$0x30]  ;;  %v3308_v56 = vor.u32 %v3307_v52, %v3306_v51 }
 0x1ea   : > { %2556 = vmatmul.f32.vlgmr.msrb.gmra.mxu1 %v5117_v29  ;;  %v4078_v29 = vld [vmem:[%s5514_s3 + $0x490] sm:$0xff] }
 0x1eb   : > { %2740 = vmatpush.xpose.msrb.mxu0 %v4069_v61  ;;  %2576 = vmatmul.f32.vlgmr.msrb.gmra.mxu2 %v5113_v27  ;;  %v3145_v27 = vld [vmem:[#allocation2 + $0x96] ss:$8 sm:$0x30] }
 0x1ec   : > { %2596 = vmatmul.f32.vlgmr.msrb.gmra.mxu3 %v5115_v28  ;;  %2780 = vmatpush.xpose.msrb.mxu2 %v4071_v60  ;;  %v3146_v31 = vor.u32 %v3145_v27, %v3144_v23  ;;  %v4112_v27 = vld [vmem:[%s5514_s3 + $0x570] sm:$0xff] }
 0x1ed   : > { %v5202_v63 = vld [vmem:[#allocation1] sm:$0xff]  ;;  %v5204_v0 = vld [vmem:[#allocation1 + $0x2d] sm:$0xff]  ;;  %4073 = vmatpush.xpose.msk.msrb.mxu3 %vm810_vm4, %v4072_v7  ;;  %2760 = vmatpush.xpose.msrb.mxu1 %v4070_v10  ;;  %v900_v15 = vpop.f32.mrf.mxu0 }
 0x1ee   : > { %v5206_v1 = vld [vmem:[#allocation1 + $0x12] sm:$0xff]  ;;  %v5213_v8 = vld [vmem:[#allocation1 + $0x1b] sm:$0xff]  ;;  %v5215_v9 = vld [vmem:[#allocation1 + $0x9] sm:$0xff] }
 0x1ef   : > { %v5221_v11 = vld [vmem:[#allocation1 + $0x24] sm:$0xff]  ;;  %2741 = vmatpush.xpose.msrb.mxu0 %v4063_v12  ;;  %v920_v17 = vpop.f32.mrf.mxu1 }
 0x1f0   : > { %2996 = vst [vmem:[#allocation1] ss:$9 sm:$0xff] %v2976_v62  ;;  %2781 = vmatpush.xpose.msrb.mxu2 %v4065_v13  ;;  %2616 = vmatmul.f32.vlgmr.msra.gmra.mxu0 %v5119_v30  ;;  %v921_v28 = vadd.f32 %v920_v17, %v900_v15  ;;  %v4099_v10 = vld [vmem:[%s5514_s3 + $0x520] sm:$0xff]  ;;  %v4102_v17 = vld [vmem:[%s5514_s3 + $0x538] sm:$0xff] }
 0x1f1   : > { %2998 = vst [vmem:[#allocation1 + $0x1] ss:$9 sm:$0xff] %v2980_v2  ;;  %4074 = vmatpush.xpose.msk.msrb.mxu3 %vm810_vm4, %v4066_v14  ;;  %2761 = vmatpush.xpose.msrb.mxu1 %v4064_v16  ;;  %v4101_v16 = vld [vmem:[%s5514_s3 + $0x530] sm:$0xff] }
 0x1f2   : > { %4060 = vmatmul.msk.f32.vlgmr.msra.gmra.mxu1 %vm810_vm4, %v5111_v26  ;;  %v4076_v26 = vld [vmem:[%s5514_s3 + $0x480] sm:$0xff] }
 0x1f3   : > { %2866 = vmatpush.xpose.msra.mxu0 %v4082_v18  ;;  %2702 = vmatmul.f32.vlgmr.msra.gmra.mxu2 %v5157_v43  ;;  %v4100_v18 = vld [vmem:[%s5514_s3 + $0x528] sm:$0xff] }
 0x1f4   : > { %2722 = vmatmul.f32.vlgmr.msra.gmra.mxu3 %v5159_v44  ;;  %v940_v32 = vpop.f32.mrf.mxu2  ;;  %2906 = vmatpush.xpose.msra.mxu2 %v4084_v21  ;;  %v960_v6 = vpop.f32.mrf.mxu3  ;;  %v4098_v44 = vld [vmem:[%s5514_s3 + $0x518] sm:$0xff]  ;;  %v4096_v21 = vld [vmem:[%s5514_s3 + $0x508] sm:$0xff] }
 0x1f5   : > { %2926 = vmatpush.xpose.msra.mxu3 %v4085_v22  ;;  %v941_v5 = vadd.f32 %v940_v32, %v921_v28  ;;  %2886 = vmatpush.xpose.msra.mxu1 %v4083_v24  ;;  %v980_v37 = vpop.f32.mrf.mxu0  ;;  %v4113_v32 = vld [vmem:[%s5514_s3 + $0x578] sm:$0xff] }
 0x1f7   : > { %2867 = vmatpush.xpose.msra.mxu0 %v4076_v26  ;;  %v961_v39 = vadd.f32 %v960_v6, %v941_v5  ;;  %v1000_v40 = vpop.f32.mrf.mxu1  ;;  %v4114_v26 = vld [vmem:[%s5514_s3 + $0x580] sm:$0xff] }
 0x1f8   : > { %v5262_v30 = vld [vmem:[#allocation1 + $0x12] sm:$0xff]  ;;  %v5267_v3 = vld [vmem:[#allocation1 + $0x24] sm:$0xff]  ;;  %v5275_v36 = vld [vmem:[#allocation1 + $0x1b] sm:$0xff]  ;;  %2907 = vmatpush.xpose.msra.mxu2 %v4078_v29  ;;  %2742 = vmatmul.f32.vlgmr.msrb.gmra.mxu0 %v5161_v45 }
 0x1f9   : > { %v5269_v4 = vld [vmem:[#allocation1 + $0x2d] sm:$0xff]  ;;  %v5271_v34 = vld [vmem:[#allocation1] sm:$0xff]  ;;  %2927 = vmatpush.xpose.msra.mxu3 %v4079_v33  ;;  %v981_v43 = vadd.f32 %v980_v37, %v961_v39  ;;  %2887 = vmatpush.xpose.msra.mxu1 %v4077_v38  ;;  %v4109_v33 = vld [vmem:[%s5514_s3 + $0x558] sm:$0xff] }
 0x1fa   : > { %v5273_v35 = vld [vmem:[#allocation1 + $0x9] sm:$0xff]  ;;  %2762 = vmatmul.f32.vlgmr.msrb.gmra.mxu1 %v5167_v48 }
 0x1fb   : > { %3162 = vst [vmem:[#allocation1] ss:$9 sm:$0xff] %v3142_v25  ;;  %2946 = vmatpush.xpose.msrb.mxu0 %v4086_v41  ;;  %v1001_v53 = vadd.f32 %v1000_v40, %v981_v43  ;;  %2782 = vmatmul.f32.vlgmr.msrb.gmra.mxu2 %v5163_v46  ;;  %v3310_v45 = vld [vmem:[#allocation2 + $0x97] ss:$8 sm:$0xf] }
 0x1fc   : > { %3164 = vst [vmem:[#allocation1 + $0x1] ss:$9 sm:$0xff] %v3146_v31  ;;  %4075 = vmatmul.msk.f32.vlgmr.msrb.gmra.mxu3 %vm810_vm4, %v5165_v47  ;;  %3032 = vmatpush.xpose.msrb.mxu2 %v4097_v42  ;;  %v4092_v48 = vld [vmem:[%s5514_s3 + $0x4e8] sm:$0xff]  ;;  %v3312_v61 = vor.u32 %v3311_v54, %v3310_v45  ;;  %v4116_v39 = vld [vmem:[%s5514_s3 + $0x590] sm:$0xff]  ;;  %v4128_v42 = vld [vmem:[%s5514_s3 + $0x5d8] sm:$0xff] }
 0x1fd   : > { %3052 = vmatpush.xpose.msrb.mxu3 %v4098_v44  ;;  %4088 = vmatpush.xpose.msk.msrb.mxu1 %vm810_vm4, %v4087_v49  ;;  %v4081_v46 = vld [vmem:[%s5514_s3 + $0x4a8] sm:$0xff]  ;;  %v1084_v2 = vpop.f32.mrf.mxu0  ;;  %v4127_v41 = vld [vmem:[%s5514_s3 + $0x5d0] sm:$0xff]  ;;  %v4117_v43 = vld [vmem:[%s5514_s3 + $0x598] sm:$0xff] }
 0x1fe   : > { %v1044_v47 = vpop.f32.mrf.mxu2  ;;  %v4115_v31 = vld [vmem:[%s5514_s3 + $0x588] sm:$0xff] }
 0x1ff   : > { %v1064_v57 = vpop.f32.mrf.mxu3  ;;  %2947 = vmatpush.xpose.msrb.mxu0 %v4080_v50  ;;  %v1045_v62 = vadd.f32 %v1044_v47, %v1001_v53  ;;  %v1104_v7 = vpop.f32.mrf.mxu1  ;;  %v4130_v47 = vld [vmem:[%s5514_s3 + $0x5e8] sm:$0xff] }
 0x200   : > { %3033 = vmatpush.xpose.msrb.mxu2 %v4091_v55  ;;  %2868 = vmatmul.f32.vlgmr.msra.gmra.mxu0 %v5202_v63  ;;  %v4129_v55 = vld [vmem:[%s5514_s3 + $0x5e0] sm:$0xff] }
 0x201   : > { %3053 = vmatpush.xpose.msrb.mxu3 %v4092_v48  ;;  %v1065_v15 = vadd.f32 %v1064_v57, %v1045_v62  ;;  %4089 = vmatpush.xpose.msk.msrb.mxu1 %vm810_vm4, %v4081_v46  ;;  %v4131_v46 = vld [vmem:[%s5514_s3 + $0x5f0] sm:$0xff]  ;;  %v4126_v62 = vld [vmem:[%s5514_s3 + $0x5c8] sm:$0xff] }
 0x202   : > { %2888 = vmatmul.f32.vlgmr.msra.gmra.mxu1 %v5215_v9  ;;  %v4095_v9 = vld [vmem:[%s5514_s3 + $0x500] sm:$0xff] }
 0x203   : > { %v5310_v58 = vld [vmem:[#allocation1 + $0x2d] sm:$0xff]  ;;  %v5312_v59 = vld [vmem:[#allocation1] sm:$0xff]  ;;  %3072 = vmatpush.xpose.msra.mxu0 %v4099_v10  ;;  %v1085_v63 = vadd.f32 %v1084_v2, %v1065_v15  ;;  %2908 = vmatmul.f32.vlgmr.msra.gmra.mxu2 %v5206_v1 }
 0x204   : > { %v5314_v60 = vld [vmem:[#allocation1 + $0x12] sm:$0xff]  ;;  %v5319_v12 = vld [vmem:[#allocation1 + $0x1b] sm:$0xff]  ;;  %v5321_v13 = vld [vmem:[#allocation1 + $0x9] sm:$0xff]  ;;  %2928 = vmatmul.f32.vlgmr.msra.gmra.mxu3 %v5213_v8  ;;  %3112 = vmatpush.xpose.msra.mxu2 %v4101_v16 }
 0x205   : > { %v5323_v14 = vld [vmem:[#allocation1 + $0x24] sm:$0xff]  ;;  %4103 = vmatpush.xpose.msk.msra.mxu3 %vm810_vm4, %v4102_v17  ;;  %v1105_v20 = vadd.f32 %v1104_v7, %v1085_v63  ;;  %3092 = vmatpush.xpose.msra.mxu1 %v4100_v18  ;;  %v4094_v8 = vld [vmem:[%s5514_s3 + $0x4f8] sm:$0xff]  ;;  %v1209_v24 = vpop.f32.mrf.mxu0 }
 0x206   : > { %3328 = vst [vmem:[#allocation1] ss:$9 sm:$0xff] %v3308_v56  ;;  %v1124_v1 = vpop.f32.mrf.mxu2  ;;  %v4132_v56 = vld [vmem:[%s5514_s3 + $0x5f8] sm:$0xff] }
 0x207   : > { %3330 = vst [vmem:[#allocation1 + $0x1] ss:$9 sm:$0xff] %v3312_v61  ;;  %v1144_v22 = vpop.f32.mrf.mxu3  ;;  %3073 = vmatpush.xpose.msra.mxu0 %v4093_v19  ;;  %v1125_v23 = vadd.f32 %v1124_v1, %v1105_v20  ;;  %v1229_v25 = vpop.f32.mrf.mxu1  ;;  %v4125_v61 = vld [vmem:[%s5514_s3 + $0x5c0] sm:$0xff]  ;;  %v4124_v7 = vld [vmem:[%s5514_s3 + $0x5b8] sm:$0xff] }
 0x208   : > { %v1230_v28 = vadd.f32 %v1229_v25, %v1209_v24  ;;  %3113 = vmatpush.xpose.msra.mxu2 %v4095_v9  ;;  %2948 = vmatmul.f32.vlgmr.msrb.gmra.mxu0 %v5221_v11  ;;  %v4106_v11 = vld [vmem:[%s5514_s3 + $0x540] sm:$0xff] }
 0x209   : > { %4104 = vmatpush.xpose.msk.msra.mxu3 %vm810_vm4, %v4096_v21  ;;  %v1145_v29 = vadd.f32 %v1144_v22, %v1125_v23  ;;  %3093 = vmatpush.xpose.msra.mxu1 %v4094_v8 }
 0x20a   : > { %4090 = vmatmul.msk.f32.vlgmr.msrb.gmra.mxu1 %vm810_vm4, %v5204_v0  ;;  %v4108_v0 = vld [vmem:[%s5514_s3 + $0x550] sm:$0xff] }
 0x20b   : > { %3198 = vmatpush.xpose.msrb.mxu0 %v4112_v27  ;;  %3034 = vmatmul.f32.vlgmr.msrb.gmra.mxu2 %v5271_v34  ;;  %v4107_v34 = vld [vmem:[%s5514_s3 + $0x548] sm:$0xff] }
 0x20c   : > { %3054 = vmatmul.f32.vlgmr.msrb.gmra.mxu3 %v5273_v35  ;;  %3238 = vmatpush.xpose.msrb.mxu2 %v4114_v26 }
 0x20d   : > { %3258 = vmatpush.xpose.msrb.mxu3 %v4115_v31  ;;  %3218 = vmatpush.xpose.msrb.mxu1 %v4113_v32  ;;  %v1289_v37 = vpop.f32.mrf.mxu0 }
 0x20e   : > { %v1249_v5 = vpop.f32.mrf.mxu2  ;;  %v3331_v16 = vld [vmem:[#allocation1] sm:$0xff]  ;;  %v3332_v17 = vld [vmem:[#allocation1 + $0x9] sm:$0xff]  ;;  %v3333_v9 = vld [vmem:[#allocation1 + $0x12] sm:$0xff] }
 0x20f   : > { %v1269_v6 = vpop.f32.mrf.mxu3  ;;  %3199 = vmatpush.xpose.msrb.mxu0 %v4106_v11  ;;  %v1250_v35 = vadd.f32 %v1249_v5, %v1230_v28  ;;  %v1309_v38 = vpop.f32.mrf.mxu1  ;;  %v3334_v8 = vld [vmem:[#allocation1 + $0x1b] sm:$0xff]  ;;  %v3335_v23 = vld [vmem:[#allocation1 + $0x24] sm:$0xff]  ;;  %v3336_v24 = vld [vmem:[#allocation1 + $0x2d] sm:$0xff] }
 0x210   : > { %3239 = vmatpush.xpose.msrb.mxu2 %v4108_v0  ;;  %3074 = vmatmul.f32.vlgmr.msra.gmra.mxu0 %v5262_v30  ;;  %v4110_v30 = vld [vmem:[%s5514_s3 + $0x560] sm:$0xff] }
 0x211   : > { %3259 = vmatpush.xpose.msrb.mxu3 %v4109_v33  ;;  %v1270_v40 = vadd.f32 %v1269_v6, %v1250_v35  ;;  %3219 = vmatpush.xpose.msrb.mxu1 %v4107_v34 }
 0x212   : > { %3094 = vmatmul.f32.vlgmr.msra.gmra.mxu1 %v5275_v36  ;;  %v4121_v36 = vld [vmem:[%s5514_s3 + $0x5a0] sm:$0xff] }
 0x213   : > { %3278 = vmatpush.xpose.msra.mxu0 %v4116_v39  ;;  %v1290_v44 = vadd.f32 %v1289_v37, %v1270_v40  ;;  %3114 = vmatmul.f32.vlgmr.msra.gmra.mxu2 %v5267_v3  ;;  %v4122_v3 = vld [vmem:[%s5514_s3 + $0x5a8] sm:$0xff] }
 0x214   : > { %4105 = vmatmul.msk.f32.vlgmr.msra.gmra.mxu3 %vm810_vm4, %v5269_v4  ;;  %3364 = vmatpush.xpose.msra.mxu2 %v4127_v41  ;;  %v4111_v4 = vld [vmem:[%s5514_s3 + $0x568] sm:$0xff] }
 0x215   : > { %3384 = vmatpush.xpose.msra.mxu3 %v4128_v42  ;;  %v1310_v49 = vadd.f32 %v1309_v38, %v1290_v44  ;;  %4118 = vmatpush.xpose.msk.msra.mxu1 %vm810_vm4, %v4117_v43  ;;  %v1415_v45 = vpop.f32.mrf.mxu0 }
 0x216   : > { %v1375_v50 = vpop.f32.mrf.mxu2 }
 0x217   : > { %v1395_v51 = vpop.f32.mrf.mxu3  ;;  %3279 = vmatpush.xpose.msra.mxu0 %v4110_v30  ;;  %v1312_v52 = vadd.f32 %v1310_v49, %v1145_v29  ;;  %v1435_v54 = vpop.f32.mrf.mxu1 }
 0x218   : > { %v1396_v53 = vadd.f32 %v1395_v51, %v1375_v50  ;;  %3365 = vmatpush.xpose.msra.mxu2 %v4121_v36  ;;  %3200 = vmatmul.f32.vlgmr.msrb.gmra.mxu0 %v5312_v59  ;;  %v4123_v59 = vld [vmem:[%s5514_s3 + $0x5b0] sm:$0xff] }
 0x219   : > { %3385 = vmatpush.xpose.msra.mxu3 %v4122_v3  ;;  %4119 = vmatpush.xpose.msk.msra.mxu1 %vm810_vm4, %v4111_v4 }
 0x21a   : > { %v1416_v48 = vadd.f32 %v1415_v45, %v1396_v53  ;;  %3220 = vmatmul.f32.vlgmr.msrb.gmra.mxu1 %v5321_v13 }
 0x21b   : > { %3404 = vmatpush.xpose.msrb.mxu0 %v4129_v55  ;;  %3240 = vmatmul.f32.vlgmr.msrb.gmra.mxu2 %v5314_v60 }
 0x21c   : > { %v1436_v57 = vadd.f32 %v1435_v54, %v1416_v48  ;;  %3260 = vmatmul.f32.vlgmr.msrb.gmra.mxu3 %v5319_v12  ;;  %3444 = vmatpush.xpose.msrb.mxu2 %v4131_v46 }
 0x21d   : > { %4133 = vmatpush.xpose.msk.msrb.mxu3 %vm810_vm4, %v4132_v56  ;;  %3424 = vmatpush.xpose.msrb.mxu1 %v4130_v47  ;;  %v1541_v12 = vpop.f32.mrf.mxu0 }
 0x21e   : > { %v1455_v2 = vpop.f32.mrf.mxu2 }
 0x21f   : > { %v1475_v60 = vpop.f32.mrf.mxu3  ;;  %3405 = vmatpush.xpose.msrb.mxu0 %v4123_v59  ;;  %v1456_v10 = vadd.f32 %v1455_v2, %v1436_v57  ;;  %v1561_v13 = vpop.f32.mrf.mxu1 }
 0x220   : > { %v1562_v15 = vadd.f32 %v1561_v13, %v1541_v12  ;;  %3445 = vmatpush.xpose.msrb.mxu2 %v4125_v61  ;;  %3280 = vmatmul.f32.vlgmr.msra.gmra.mxu0 %v5323_v14 }
 0x221   : > { %4134 = vmatpush.xpose.msk.msrb.mxu3 %vm810_vm4, %v4126_v62  ;;  %v1476_v18 = vadd.f32 %v1475_v60, %v1456_v10  ;;  %3425 = vmatpush.xpose.msrb.mxu1 %v4124_v7 }
 0x222   : > { %4120 = vmatmul.msk.f32.vlgmr.msra.gmra.mxu1 %vm810_vm4, %v5310_v58 }
 0x223   : > { %v1478_v63 = vadd.f32 %v1476_v18, %v1312_v52  ;;  %3366 = vmatmul.f32.vlgmr.msra.gmra.mxu2 %v3331_v16 }
 0x224   : > { %3386 = vmatmul.f32.vlgmr.msra.gmra.mxu3 %v3332_v17 }
 0x225   : > { %v1621_v1 = vpop.f32.mrf.mxu0 }
 0x226   : > { %v1581_v19 = vpop.f32.mrf.mxu2 }
 0x227   : > { %v1601_v20 = vpop.f32.mrf.mxu3  ;;  %v1582_v21 = vadd.f32 %v1581_v19, %v1562_v15  ;;  %v1641_v22 = vpop.f32.mrf.mxu1 }
 0x228   : > { %3406 = vmatmul.f32.vlgmr.msrb.gmra.mxu0 %v3333_v9 }
 0x229   : > { %v1602_v25 = vadd.f32 %v1601_v20, %v1582_v21 }
 0x22a   : > { %3426 = vmatmul.f32.vlgmr.msrb.gmra.mxu1 %v3334_v8 }
 0x22b   : > { %v1622_v14 = vadd.f32 %v1621_v1, %v1602_v25  ;;  %3446 = vmatmul.f32.vlgmr.msrb.gmra.mxu2 %v3335_v23 }
 0x22c   : > { %4135 = vmatmul.msk.f32.vlgmr.msrb.gmra.mxu3 %vm810_vm4, %v3336_v24 }
 0x22d   : > { %v1642_v58 = vadd.f32 %v1641_v22, %v1622_v14  ;;  %v1747_v31 = vpop.f32.mrf.mxu0 }
 0x22e   : > { %v1707_v27 = vpop.f32.mrf.mxu2 }
 0x22f   : > { %v1727_v28 = vpop.f32.mrf.mxu3  ;;  %v1644_v29 = vadd.f32 %v1642_v58, %v1478_v63  ;;  %v1767_v32 = vpop.f32.mrf.mxu1 }
 0x230   : > { %v1728_v26 = vadd.f32 %v1727_v28, %v1707_v27 }
 0x232   : > { %v1748_v11 = vadd.f32 %v1747_v31, %v1728_v26 }
 0x234   : > { %v1768_v0 = vadd.f32 %v1767_v32, %v1748_v11 }
 0x235   : > { %v1873_v34 = vpop.f32.mrf.mxu0 }
 0x236   : > { %v1787_v33 = vpop.f32.mrf.mxu2 }
 0x237   : > { %v1807_v5 = vpop.f32.mrf.mxu3  ;;  %v1788_v6 = vadd.f32 %v1787_v33, %v1768_v0  ;;  %v1893_v35 = vpop.f32.mrf.mxu1 }
 0x238   : > { %v1894_v37 = vadd.f32 %v1893_v35, %v1873_v34 }
 0x239   : > { %v1808_v38 = vadd.f32 %v1807_v5, %v1788_v6 }
 0x23b   : > { %v1810_v39 = vadd.f32 %v1808_v38, %v1644_v29  ;;  %v3479_v38 = vld [vmem:[%s5516_s5] sm:$0x3] }
 0x23c   : > { %4136 = vmatpush.xpose.msk.msra.mxu0 %vm3484_vm5, %v3479_v38 }
 0x23d   : > { %v1953_v43 = vpop.f32.mrf.mxu0 }
 0x23e   : > { %v1913_v40 = vpop.f32.mrf.mxu2 }
 0x23f   : > { %v1933_v41 = vpop.f32.mrf.mxu3  ;;  %v1914_v42 = vadd.f32 %v1913_v40, %v1894_v37  ;;  %v1973_v44 = vpop.f32.mrf.mxu1 }
 0x241   : > { %v1934_v30 = vadd.f32 %v1933_v41, %v1914_v42 }
 0x243   : > { %v1954_v49 = vadd.f32 %v1953_v43, %v1934_v30 }
 0x245   : > { %v1974_v36 = vadd.f32 %v1973_v44, %v1954_v49  ;;  %v2079_v52 = vpop.f32.mrf.mxu0 }
 0x246   : > { %v2039_v3 = vpop.f32.mrf.mxu2 }
 0x247   : > { %v2059_v50 = vpop.f32.mrf.mxu3  ;;  %v1976_v51 = vadd.f32 %v1974_v36, %v1810_v39  ;;  %v2099_v53 = vpop.f32.mrf.mxu1 }
 0x248   : > { %v2060_v4 = vadd.f32 %v2059_v50, %v2039_v3 }
 0x24a   : > { %v2080_v45 = vadd.f32 %v2079_v52, %v2060_v4 }
 0x24c   : > { %v2100_v54 = vadd.f32 %v2099_v53, %v2080_v45 }
 0x24d   : > { %v2205_v56 = vpop.f32.mrf.mxu0 }
 0x24e   : > { %v2119_v55 = vpop.f32.mrf.mxu2 }
 0x24f   : > { %v2139_v48 = vpop.f32.mrf.mxu3  ;;  %v2120_v46 = vadd.f32 %v2119_v55, %v2100_v54  ;;  %v2225_v47 = vpop.f32.mrf.mxu1 }
 0x250   : > { %v2226_v57 = vadd.f32 %v2225_v47, %v2205_v56 }
 0x251   : > { %v2140_v59 = vadd.f32 %v2139_v48, %v2120_v46 }
 0x253   : > { %v2142_v61 = vadd.f32 %v2140_v59, %v1976_v51 }
 0x255   : > { %v2285_v7 = vpop.f32.mrf.mxu0 }
 0x256   : > { %v2245_v62 = vpop.f32.mrf.mxu2 }
 0x257   : > { %v2265_v2 = vpop.f32.mrf.mxu3  ;;  %v2246_v60 = vadd.f32 %v2245_v62, %v2226_v57  ;;  %v2305_v10 = vpop.f32.mrf.mxu1 }
 0x259   : > { %v2266_v12 = vadd.f32 %v2265_v2, %v2246_v60 }
 0x25b   : > { %v2286_v13 = vadd.f32 %v2285_v7, %v2266_v12 }
 0x25d   : > { %v2306_v15 = vadd.f32 %v2305_v10, %v2286_v13  ;;  %v2411_v63 = vpop.f32.mrf.mxu0 }
 0x25e   : > { %v2371_v16 = vpop.f32.mrf.mxu2 }
 0x25f   : > { %v2391_v17 = vpop.f32.mrf.mxu3  ;;  %v5447_v18 = vadd.f32 %v2306_v15, %v2142_v61  ;;  %v2431_v19 = vpop.f32.mrf.mxu1 }
 0x260   : > { %v2392_v37 = vadd.f32 %v2391_v17, %v2371_v16 }
 0x262   : > { %v2412_v30 = vadd.f32 %v2411_v63, %v2392_v37 }
 0x264   : > { %v2432_v50 = vadd.f32 %v2431_v19, %v2412_v30 }
 0x265   : > { %v2537_v21 = vpop.f32.mrf.mxu0 }
 0x266   : > { %v2451_v20 = vpop.f32.mrf.mxu2 }
 0x267   : > { %v2471_v9 = vpop.f32.mrf.mxu3  ;;  %v2557_v1 = vpop.f32.mrf.mxu1  ;;  %v2452_v54 = vadd.f32 %v2451_v20, %v2432_v50 }
 0x268   : > { %v2558_v39 = vadd.f32 %v2557_v1, %v2537_v21 }
 0x269   : > { %v2472_v62 = vadd.f32 %v2471_v9, %v2452_v54 }
 0x26b   : > { %v2474_v16 = vadd.f32 %v2472_v62, %v5447_v18 }
 0x26d   : > { %v2617_v23 = vpop.f32.mrf.mxu0 }
 0x26e   : > { %v2577_v22 = vpop.f32.mrf.mxu2 }
 0x26f   : > { %v2597_v8 = vpop.f32.mrf.mxu3  ;;  %v2637_v24 = vpop.f32.mrf.mxu1  ;;  %v2578_v44 = vadd.f32 %v2577_v22, %v2558_v39 }
 0x271   : > { %v2598_v3 = vadd.f32 %v2597_v8, %v2578_v44 }
 0x273   : > { %v2618_v46 = vadd.f32 %v2617_v23, %v2598_v3 }
 0x275   : > { %v2743_v58 = vpop.f32.mrf.mxu0  ;;  %v2638_v60 = vadd.f32 %v2637_v24, %v2618_v46 }
 0x276   : > { %v2703_v25 = vpop.f32.mrf.mxu2 }
 0x277   : > { %v2723_v14 = vpop.f32.mrf.mxu3  ;;  %v2763_v27 = vpop.f32.mrf.mxu1  ;;  %v2640_v21 = vadd.f32 %v2638_v60, %v2474_v16 }
 0x278   : > { %v2724_v49 = vadd.f32 %v2723_v14, %v2703_v25 }
 0x27a   : > { %v2744_v51 = vadd.f32 %v2743_v58, %v2724_v49 }
 0x27c   : > { %v2764_v47 = vadd.f32 %v2763_v27, %v2744_v51 }
 0x27d   : > { %v2869_v26 = vpop.f32.mrf.mxu0 }
 0x27e   : > { %v2783_v28 = vpop.f32.mrf.mxu2 }
 0x27f   : > { %v2803_v29 = vpop.f32.mrf.mxu3  ;;  %v2889_v31 = vpop.f32.mrf.mxu1  ;;  %v2784_v2 = vadd.f32 %v2783_v28, %v2764_v47 }
 0x280   : > { %v2890_v36 = vadd.f32 %v2889_v31, %v2869_v26 }
 0x281   : > { %v2804_v17 = vadd.f32 %v2803_v29, %v2784_v2 }
 0x283   : > { %v2806_v23 = vadd.f32 %v2804_v17, %v2640_v21 }
 0x285   : > { %v2949_v0 = vpop.f32.mrf.mxu0 }
 0x286   : > { %v2909_v32 = vpop.f32.mrf.mxu2 }
 0x287   : > { %v2929_v11 = vpop.f32.mrf.mxu3  ;;  %v2969_v33 = vpop.f32.mrf.mxu1  ;;  %v2910_v4 = vadd.f32 %v2909_v32, %v2890_v36  ;;  %v4257_v32 = vld [vmem:[%s5515_s4] ss:$0 sm:$0xff] }
 0x289   : > { %v2930_v57 = vadd.f32 %v2929_v11, %v2910_v4 }
 0x28b   : > { %v2950_v7 = vadd.f32 %v2949_v0, %v2930_v57 }
 0x28d   : > { %v3075_v34 = vpop.f32.mrf.mxu0  ;;  %v2970_v1 = vadd.f32 %v2969_v33, %v2950_v7 }
 0x28e   : > { %v3035_v5 = vpop.f32.mrf.mxu2 }
 0x28f   : > { %v3055_v6 = vpop.f32.mrf.mxu3  ;;  %v3095_v35 = vpop.f32.mrf.mxu1  ;;  %v2972_v25 = vadd.f32 %v2970_v1, %v2806_v23 }
 0x290   : > { %v3056_v52 = vadd.f32 %v3055_v6, %v3035_v5 }
 0x292   : > { %v3076_v59 = vadd.f32 %v3075_v34, %v3056_v52 }
 0x294   : > { %v3096_v10 = vadd.f32 %v3095_v35, %v3076_v59 }
 0x295   : > { %v3201_v42 = vpop.f32.mrf.mxu0 }
 0x296   : > { %v3115_v40 = vpop.f32.mrf.mxu2 }
 0x297   : > { %v3135_v41 = vpop.f32.mrf.mxu3  ;;  %v3221_v43 = vpop.f32.mrf.mxu1  ;;  %v3116_v63 = vadd.f32 %v3115_v40, %v3096_v10 }
 0x298   : > { %v3222_v55 = vadd.f32 %v3221_v43, %v3201_v42 }
 0x299   : > { %v3136_v24 = vadd.f32 %v3135_v41, %v3116_v63 }
 0x29b   : > { %v3138_v18 = vadd.f32 %v3136_v24, %v2972_v25 }
 0x29d   : > { %v3281_v48 = vpop.f32.mrf.mxu0 }
 0x29e   : > { %v3241_v53 = vpop.f32.mrf.mxu2 }
 0x29f   : > { %v3261_v45 = vpop.f32.mrf.mxu3  ;;  %v3301_v56 = vpop.f32.mrf.mxu1  ;;  %v3242_v61 = vadd.f32 %v3241_v53, %v3222_v55 }
 0x2a1   : > { %v3262_v12 = vadd.f32 %v3261_v45, %v3242_v61 }
 0x2a3   : > { %v3282_v22 = vadd.f32 %v3281_v48, %v3262_v12 }
 0x2a5   : > { %v3407_v20 = vpop.f32.mrf.mxu0  ;;  %v3302_v14 = vadd.f32 %v3301_v56, %v3282_v22 }
 0x2a6   : > { %v3367_v13 = vpop.f32.mrf.mxu2 }
 0x2a7   : > { %v3387_v15 = vpop.f32.mrf.mxu3  ;;  %v3427_v9 = vpop.f32.mrf.mxu1  ;;  %v3304_v26 = vadd.f32 %v3302_v14, %v3138_v18 }
 0x2a8   : > { %v3388_v19 = vadd.f32 %v3387_v15, %v3367_v13 }
 0x2aa   : > { %v3408_v8 = vadd.f32 %v3407_v20, %v3388_v19 }
 0x2ac   : > { %v3428_v58 = vadd.f32 %v3427_v9, %v3408_v8 }
 0x2ae   : > { %v3447_v27 = vpop.f32.mrf.mxu2 }
 0x2af   : > { %v3467_v28 = vpop.f32.mrf.mxu3  ;;  %v3448_v29 = vadd.f32 %v3447_v27, %v3428_v58 }
 0x2b1   : > { %v3468_v31 = vadd.f32 %v3467_v28, %v3448_v29 }
 0x2b3   : > { %v3470_v11 = vadd.f32 %v3468_v31, %v3304_v26 }
 0x2b5   : > { %v3475_v0 = vadd.f32 %v4257_v32, %v3470_v11 }
 0x2b7   : > { %v3476_v33 = vmax.f32 %v3475_v0, 0.0 }
 0x2b9   : > { %4137 = vmatmul.msk.f32.vlgmr.msra.gmra.mxu0 %vm3484_vm5, %v3476_v33  ;;  %3478 = vst.msk [vmem:[%s410_s6] sm:$0x3] %vm3477_vm6, %v3476_v33 }
 0x2ba   : > { %4286 = shalt.err (!%p4283_p10)
}
 0x2bb   : > { %4176 = dma.vmem_to_hbm [thread:$0]  (%p4470_p3), %s3565_s21, 32, %s3567_s15, %s3534_s16   ;;  %vm3511_vm7 = vcmask 9216  }
 0x2bc   : > { %s5559_s27 = sld [smem:[#allocation18_spill]] }
 0x2c2   : > { %v4258_v5 = vld [vmem:[%s5559_s27] ss:$0 sm:$0xff] }
 0x336   : > { %v3508_v6 = vpop.f32.mrf.mxu0 }
 0x337   : > { %v3509_v34 = vadd.f32 %v4258_v5, %v3508_v6 }
 0x339   : > { %3512 = vst.msk [vmem:[%s4524_s11] sm:$0x3] %vm3511_vm7, %v3509_v34 }
 0x33a PF: > { %s5560_s12 = sld [smem:[#allocation11_spill]] }
 0x33b   : > { %s5561_s19 = sld [smem:[#allocation6_spill]] }
 0x340   : > { %p4182_p11 = scmp.ge.s32.totalorder %s5560_s12, 2 }
 0x341   : > { %s3607_s28 = sand.u32 1, %s5561_s19  }
 0x342   : > { %p4179_p12 = pnand %p4182_p11, %p4479_p8  ;;  %s3608_s26 = scalar_lea.sflag [#allocation4], %s3607_s28 }
 0x344   : > { %p4180_p13 = pneg %p4179_p12 }
 0x346   : > { %4324 = dma.done.wait (%p4180_p13), %s3608_s26, 32  }
 0x347   : > { %4326 = vsyncadd (%p4180_p13), %s3608_s26, 4294967264  ;;  %s24_s20 = sadd.s32 1, %s5560_s12   ;;  %s5563_s13 = sld [smem:[#allocation7_spill]] }
 0x348   : > { %p21_p3 = scmp.ge.s32.totalorder %s24_s20, 10   ;;  %s5564_s14 = sld [smem:[#allocation8_spill]] }
 0x349   : > { %s5565_s15 = sld [smem:[#allocation16_spill]] }
 0x34a   : > { %s5566_s16 = sld [smem:[#allocation9_spill]]  ;;  %23 = sbr.rel (!%p21_p3) target bundleno = 9 (0x9), region = 203 }
 0x34b   : > { %s5567_s17 = sld [smem:[#allocation10_spill]] }
 0x34c   : > { %s5568_s18 = sld [smem:[#allocation12_spill]] }
 0x34d   : > { %s5569_s19 = sld [smem:[#allocation14_spill]] }
 0x34f   :  { %3625 = vsyncpa [#allocation4], 1 }
 0x350   :  { %3627 = vsyncpa [#allocation4 + $0x1], 1 }

</bundles_post_ra>
